<compile_context>
chip_gen: v7x
topology: tpu7x:2x2x1
jax: 0.10.0
libtpu: 0.0.40
codegen_flags: <defaults>
</compile_context>

<pallas_src>
import jax
import jax.numpy as jnp
from jax.experimental import pallas as pl
from jax.experimental.pallas import tpu as pltpu

EPS = 1e-5
NEG_SLOPE = 0.01
# f32 keeps the self-check inside the 2e-3 tolerance of the pure-f32 reference.
# Set to jnp.bfloat16 on v6e/v7x when the accuracy budget allows.
MXU_DTYPE = jnp.float32


def _physical_vmem_bytes():
    try:
        return int(pltpu.get_tpu_info().vmem_capacity_bytes)
    except Exception:
        return 64 * 2**20  # conservative fallback (v7x per-TC size)


_PHYS_VMEM = _physical_vmem_bytes()


# --------------------------------------------------------------------------- #
# Kernels
# --------------------------------------------------------------------------- #
def _conv_taps_kernel(xp_ref, wd1_ref, wd2_ref, y1_ref, y2_ref, st_ref):
    """Pass 1: both dilated 3x3 convs (no bias) + lane-dense BN sum/sumsq accum.

    xp_ref : (Hp, Wp*Cin) padded image of the current batch element (resident).
    wd*_ref: (3, Wp*Cin, W*Cout) per-kernel-row block weights (kw taps folded).
    y*_ref : (TH, W*Cout) raw conv output row-tile (lane-dense).
    st_ref : (4, W*Cout) per-batch resident accumulator:
             rows = [sum1, sumsq1, sum2, sumsq2], per (w, cout) lane.
    """
    th, wc = y1_ref.shape
    i = pl.program_id(1)
    row0 = pl.multiple_of(i * th, th)

    acc1 = jnp.zeros((th, wc), jnp.float32)
    acc2 = jnp.zeros((th, wc), jnp.float32)
    for kh in range(3):
        rows1 = xp_ref[pl.ds(row0 + 1 + kh, th), :]      # dilation-1 rows (pad 2-1)
        acc1 = acc1 + jnp.dot(rows1, wd1_ref[kh], preferred_element_type=jnp.float32)
        rows2 = xp_ref[pl.ds(row0 + 2 * kh, th), :]      # dilation-2 rows
        acc2 = acc2 + jnp.dot(rows2, wd2_ref[kh], preferred_element_type=jnp.float32)
    y1_ref[...] = acc1.astype(y1_ref.dtype)
    y2_ref[...] = acc2.astype(y2_ref.dtype)

    @pl.when(i == 0)                                     # per-batch init
    def _():
        st_ref[...] = jnp.zeros_like(st_ref)

    st_ref[...] = st_ref[...] + jnp.concatenate(
        [jnp.sum(acc1, axis=0, keepdims=True),
         jnp.sum(acc1 * acc1, axis=0, keepdims=True),
         jnp.sum(acc2, axis=0, keepdims=True),
         jnp.sum(acc2 * acc2, axis=0, keepdims=True)], axis=0)


def _combine_kernel(y1_ref, y2_ref, a1_ref, b1_ref, a2_ref, b2_ref,
                    w3a_ref, w3b_ref, y3_ref, st_ref):
    """Pass 2: BN+LeakyReLU both branches, 1x1 conv (no concat), BN3 accum."""
    z1 = y1_ref[...].astype(jnp.float32) * a1_ref[...] + b1_ref[...]
    z1 = jnp.where(z1 >= 0, z1, NEG_SLOPE * z1)
    z2 = y2_ref[...].astype(jnp.float32) * a2_ref[...] + b2_ref[...]
    z2 = jnp.where(z2 >= 0, z2, NEG_SLOPE * z2)

    y3 = (jnp.dot(z1.astype(w3a_ref.dtype), w3a_ref[...],
                  preferred_element_type=jnp.float32)
          + jnp.dot(z2.astype(w3b_ref.dtype), w3b_ref[...],
                    preferred_element_type=jnp.float32))
    y3_ref[...] = y3.astype(y3_ref.dtype)

    @pl.when(pl.program_id(1) == 0)                      # per-batch init
    def _():
        st_ref[...] = jnp.zeros_like(st_ref)

    st_ref[...] = st_ref[...] + jnp.concatenate(
        [jnp.sum(y3, axis=0, keepdims=True),
         jnp.sum(y3 * y3, axis=0, keepdims=True)], axis=0)


def _bn_act_kernel(y3_ref, a3_ref, b3_ref, o_ref):
    """Pass 3: final BN + LeakyReLU (purely elementwise, fully parallel)."""
    z = y3_ref[...].astype(jnp.float32) * a3_ref[...] + b3_ref[...]
    o_ref[...] = jnp.where(z >= 0, z, NEG_SLOPE * z)


# --------------------------------------------------------------------------- #
# Weight / layout preprocessing (done once per call in the wrapper; in a real
# model these depend only on the parameters and would be precomputed).
# --------------------------------------------------------------------------- #
def _row_conv_weight(wconv, W, Wp, Cin, Cout, dilation):
    """(3, Wp*Cin, W*Cout): one block-structured matrix per kernel row kh.

    Column mapping: input col (w + 2 + dilation*(kw-1)) * Cin + ci
                    -> output col w*Cout + co, value wconv[kh, kw, ci, co].
    """
    mats = []
    for kh in range(3):
        m = jnp.zeros((Wp * Cin, W * Cout), jnp.float32)
        for kw in range(3):
            rows = jnp.arange(W) + 2 + dilation * (kw - 1)
            perm = jnp.zeros((Wp, W), jnp.float32).at[rows, jnp.arange(W)].set(1.0)
            m = m + jnp.kron(perm, wconv[kh, kw].astype(jnp.float32))
        mats.append(m)
    return jnp.stack(mats, axis=0)


def _block_diag_1x1(w, W):
    # (Cout, Cout) -> (W*Cout, W*Cout) block-diagonal (per output column w).
    return jnp.kron(jnp.eye(W, dtype=jnp.float32), w.astype(jnp.float32))


def _bn_scale_shift(s, q, n, gamma, beta):
    mean = s / n
    var = q / n - mean * mean                 # one-pass biased variance (f32)
    scale = gamma * jax.lax.rsqrt(var + EPS)
    shift = beta - mean * scale
    return scale, shift


def _tile_row(v, W):
    # (Cout,) -> (1, W*Cout) matching the lane layout (w-major, channel-minor).
    return jnp.tile(v, W).reshape(1, -1)


def _pick_row_tile(H, max_tile=128):
    """Largest multiple of 8 that divides H, capped at max_tile."""
    if H % 8 != 0:
        return H
    th = 8
    cand = 8
    while cand <= min(H, max_tile):
        if H % cand == 0:
            th = cand
        cand += 8
    return th


def _vmem_limit(step_bytes):
    # ~4x per-step block footprint (double buffering + headroom), floored at
    # the 32 MiB scoped default, and always capped well below the detected
    # physical VMEM (64 MiB on v7x, 128 MiB on v5e/v6e).
    cap = max(32 * 2**20, int(0.75 * _PHYS_VMEM))
    return int(min(cap, max(32 * 2**20, 4 * int(step_bytes))))


# --------------------------------------------------------------------------- #
# Forward
# --------------------------------------------------------------------------- #
def conv_forward_nhwc(x_nhwc, params):
    """Internal lane-dense NHWC path (use this end-to-end to avoid transposes)."""
    B, H, W, Cin = x_nhwc.shape
    Cout = params["w1"].shape[-1]
    WC = W * Cout
    Hp, Wp = H + 4, W + 4
    TH = _pick_row_tile(H)
    n_pix = float(B * H * W)
    f32 = jnp.float32
    mxu_bytes = jnp.dtype(MXU_DTYPE).itemsize

    # One padded copy feeds both dilation branches.
    xp = jnp.pad(x_nhwc, ((0, 0), (2, 2), (2, 2), (0, 0)))
    xp = xp.reshape(B, Hp, Wp * Cin).astype(MXU_DTYPE)

    # Fold the 3x3 taps + channel mixing into lane-dense row weights.
    wd1 = _row_conv_weight(params["w1"], W, Wp, Cin, Cout, 1).astype(MXU_DTYPE)
    wd2 = _row_conv_weight(params["w2"], W, Wp, Cin, Cout, 2).astype(MXU_DTYPE)
    w3a = _block_diag_1x1(params["w3"][:Cout], W).astype(MXU_DTYPE)  # (WC, WC)
    w3b = _block_diag_1x1(params["w3"][Cout:], W).astype(MXU_DTYPE)

    grid = (B, H // TH)
    act_spec = pl.BlockSpec((None, TH, WC), lambda b, i: (b, i, 0))
    xp_spec = pl.BlockSpec((None, Hp, Wp * Cin), lambda b, i: (b, 0, 0))
    wd_spec = pl.BlockSpec((3, Wp * Cin, WC), lambda b, i: (0, 0, 0))
    row_spec = pl.BlockSpec((1, WC), lambda b, i: (0, 0))
    bd_spec = pl.BlockSpec((WC, WC), lambda b, i: (0, 0))
    st4_spec = pl.BlockSpec((None, 4, WC), lambda b, i: (b, 0, 0))
    st2_spec = pl.BlockSpec((None, 2, WC), lambda b, i: (b, 0, 0))

    # ---------------- pass 1: dilated convs + BN1/BN2 statistics -------------
    step1_bytes = (Hp * Wp * Cin * mxu_bytes + 2 * 3 * Wp * Cin * WC * mxu_bytes
                   + 2 * TH * WC * 4 + 4 * WC * 4)
    y1raw, y2raw, st12 = pl.pallas_call(
        _conv_taps_kernel,
        grid=grid,
        in_specs=[xp_spec, wd_spec, wd_spec],
        out_specs=(act_spec, act_spec, st4_spec),
        out_shape=(jax.ShapeDtypeStruct((B, H, WC), f32),
                   jax.ShapeDtypeStruct((B, H, WC), f32),
                   jax.ShapeDtypeStruct((B, 4, WC), f32)),
        compiler_params=pltpu.CompilerParams(
            # batch axis parallel (stats are batch-indexed), row axis carries
            # the per-batch stats accumulator -> arbitrary.
            dimension_semantics=("parallel", "arbitrary"),
            vmem_limit_bytes=_vmem_limit(step1_bytes)),
    )(xp, wd1, wd2)

    # Lane-dense per-batch partial sums -> per-channel stats in the wrapper.
    st12_c = jnp.sum(jnp.sum(st12, axis=0).reshape(4, W, Cout), axis=1)  # (4, Cout)
    sc1, sh1 = _bn_scale_shift(st12_c[0], st12_c[1], n_pix, params["g1"], params["be1"])
    sc2, sh2 = _bn_scale_shift(st12_c[2], st12_c[3], n_pix, params["g2"], params["be2"])
    a1r, b1r = _tile_row(sc1, W), _tile_row(sh1, W)
    a2r, b2r = _tile_row(sc2, W), _tile_row(sh2, W)

    # ---------------- pass 2: BN+LReLU both branches, 1x1 conv, BN3 stats ----
    step2_bytes = (3 * TH * WC * 4 + 4 * WC * 4 + 2 * WC * WC * mxu_bytes
                   + 2 * WC * 4)
    y3raw, st3 = pl.pallas_call(
        _combine_kernel,
        grid=grid,
        in_specs=[act_spec, act_spec, row_spec, row_spec, row_spec, row_spec,
                  bd_spec, bd_spec],
        out_specs=(act_spec, st2_spec),
        out_shape=(jax.ShapeDtypeStruct((B, H, WC), f32),
                   jax.ShapeDtypeStruct((B, 2, WC), f32)),
        compiler_params=pltpu.CompilerParams(
            dimension_semantics=("parallel", "arbitrary"),
            vmem_limit_bytes=_vmem_limit(step2_bytes)),
    )(y1raw, y2raw, a1r, b1r, a2r, b2r, w3a, w3b)

    st3_c = jnp.sum(jnp.sum(st3, axis=0).reshape(2, W, Cout), axis=1)    # (2, Cout)
    sc3, sh3 = _bn_scale_shift(st3_c[0], st3_c[1], n_pix, params["g3"], params["be3"])
    a3r, b3r = _tile_row(sc3, W), _tile_row(sh3, W)

    # ---------------- pass 3: final BN + LeakyReLU (fully parallel) ----------
    step3_bytes = 2 * TH * WC * 4 + 2 * WC * 4
    out = pl.pallas_call(
        _bn_act_kernel,
        grid=grid,
        in_specs=[act_spec, row_spec, row_spec],
        out_specs=act_spec,
        out_shape=jax.ShapeDtypeStruct((B, H, WC), f32),
        compiler_params=pltpu.CompilerParams(
            dimension_semantics=("parallel", "parallel"),     # megacore-friendly
            vmem_limit_bytes=_vmem_limit(step3_bytes)),
    )(y3raw, a3r, b3r)

    return out.reshape(B, H, W, Cout)


@jax.jit
def conv_module_forward(x_nchw, params):
    """Public NCHW API matching the PyTorch module. In a real model keep the
    lane-dense NHWC path (conv_forward_nhwc) end-to-end to avoid the two
    layout transposes around the kernels."""
    x = jnp.transpose(x_nchw, (0, 2, 3, 1))                   # NCHW -> NHWC
    y = conv_forward_nhwc(x, params)
    return jnp.transpose(y, (0, 3, 1, 2))                     # NHWC -> NCHW


# --------------------------------------------------------------------------- #
# Params + pure-JAX reference (PyTorch semantics) for verification
# --------------------------------------------------------------------------- #
def init_params(key, in_features, out_features):
    ks = jax.random.split(key, 6)
    f32 = jnp.float32
    return {
        "w1": jax.random.normal(ks[0], (3, 3, in_features, out_features), f32) * 0.1,
        "b1": jax.random.normal(ks[1], (out_features,), f32) * 0.1,
        "w2": jax.random.normal(ks[2], (3, 3, in_features, out_features), f32) * 0.1,
        "b2": jax.random.normal(ks[3], (out_features,), f32) * 0.1,
        "w3": jax.random.normal(ks[4], (2 * out_features, out_features), f32) * 0.1,
        "b3": jax.random.normal(ks[5], (out_features,), f32) * 0.1,
        "g1": jnp.ones((out_features,), f32), "be1": jnp.zeros((out_features,), f32),
        "g2": jnp.ones((out_features,), f32), "be2": jnp.zeros((out_features,), f32),
        "g3": jnp.ones((out_features,), f32), "be3": jnp.zeros((out_features,), f32),
    }


def reference_forward(x, params):
    def conv2d(x, w, b, d):
        wt = jnp.transpose(w, (3, 2, 0, 1))  # -> OIHW
        y = jax.lax.conv_general_dilated(
            x, wt, window_strides=(1, 1), padding=((d, d), (d, d)),
            rhs_dilation=(d, d), dimension_numbers=("NCHW", "OIHW", "NCHW"))
        return y + b.reshape(1, -1, 1, 1)

    def bn_lrelu(y, g, be):
        mean = jnp.mean(y, axis=(0, 2, 3), keepdims=True)
        var = jnp.mean(jnp.square(y - mean), axis=(0, 2, 3), keepdims=True)
        z = (y - mean) * jax.lax.rsqrt(var + EPS)
        z = z * g.reshape(1, -1, 1, 1) + be.reshape(1, -1, 1, 1)
        return jnp.where(z >= 0, z, NEG_SLOPE * z)

    y1 = bn_lrelu(conv2d(x, params["w1"], params["b1"], 1), params["g1"], params["be1"])
    y2 = bn_lrelu(conv2d(x, params["w2"], params["b2"], 2), params["g2"], params["be2"])
    cat = jnp.concatenate([y1, y2], axis=1)
    y3 = jnp.einsum("bchw,co->bohw", cat, params["w3"]) + params["b3"].reshape(1, -1, 1, 1)
    return bn_lrelu(y3, params["g3"], params["be3"])


if __name__ == "__main__":
    B, Cin, H, W = 2, 4, 16, 16
    Cout = 8

    key = jax.random.PRNGKey(0)
    kx, kp = jax.random.split(key)
    x = jax.random.normal(kx, (B, Cin, H, W), jnp.float32)
    params = init_params(kp, Cin, Cout)

    out = jax.block_until_ready(conv_module_forward(x, params))
    ref = jax.block_until_ready(reference_forward(x, params))

    assert out.shape == (B, Cout, H, W), out.shape
    max_err = float(jnp.max(jnp.abs(out - ref)))
    assert jnp.allclose(out, ref, atol=2e-3, rtol=2e-3), max_err

    print("KERNEL_OK")
</pallas_src>

<mosaic_0001>
module attributes {stable_mosaic.version = 11 : i64} {
  func.func @_conv_taps_kernel(%arg0: i32, %arg1: i32, %arg2: memref<1x20x80xf32, #tpu.memory_space<vmem>>, %arg3: memref<3x80x128xf32, #tpu.memory_space<vmem>>, %arg4: memref<3x80x128xf32, #tpu.memory_space<vmem>>, %arg5: memref<1x16x128xf32, #tpu.memory_space<vmem>>, %arg6: memref<1x16x128xf32, #tpu.memory_space<vmem>>, %arg7: memref<1x4x128xf32, #tpu.memory_space<vmem>>) attributes {dimension_semantics = [#tpu.dimension_semantics<parallel>, #tpu.dimension_semantics<arbitrary>], iteration_bounds = array<i64: 2, 1>, scalar_prefetch = 0 : i64, scratch_operands = 0 : i64, tpu.core_type = #tpu.core_type<tc>, window_params = [{transform_indices = @transform_0, window_bounds = array<i64: 1, 20, 80>}, {pipeline_mode = #tpu.pipeline_mode<synchronous>, transform_indices = @transform_1, window_bounds = array<i64: 3, 80, 128>}, {pipeline_mode = #tpu.pipeline_mode<synchronous>, transform_indices = @transform_2, window_bounds = array<i64: 3, 80, 128>}, {transform_indices = @transform_3, window_bounds = array<i64: 1, 16, 128>}, {transform_indices = @transform_4, window_bounds = array<i64: 1, 16, 128>}, {transform_indices = @transform_5, window_bounds = array<i64: 1, 4, 128>}]} {
    %c16_i32 = arith.constant 16 : i32
    %0 = arith.muli %arg1, %c16_i32 : i32
    %1 = tpu.assume_multiple %0, 16 : i32
    %cst = arith.constant 0.000000e+00 : f32
    %2 = vector.broadcast %cst : f32 to vector<16x128xf32>
    %cst_0 = arith.constant 0.000000e+00 : f32
    %3 = vector.broadcast %cst_0 : f32 to vector<16x128xf32>
    %c1_i32 = arith.constant 1 : i32
    %4 = arith.addi %1, %c1_i32 : i32
    %c0_i32 = arith.constant 0 : i32
    %5 = arith.addi %4, %c0_i32 : i32
    %c0 = arith.constant 0 : index
    %6 = arith.index_cast %5 : i32 to index
    %c0_1 = arith.constant 0 : index
    %7 = vector.load %arg2[%c0, %6, %c0_1] : memref<1x20x80xf32, #tpu.memory_space<vmem>>, vector<1x16x80xf32>
    %8 = vector.shape_cast %7 : vector<1x16x80xf32> to vector<16x80xf32>
    %c0_2 = arith.constant 0 : index
    %c0_3 = arith.constant 0 : index
    %c0_4 = arith.constant 0 : index
    %9 = vector.load %arg3[%c0_2, %c0_3, %c0_4] : memref<3x80x128xf32, #tpu.memory_space<vmem>>, vector<1x80x128xf32>
    %10 = vector.shape_cast %9 : vector<1x80x128xf32> to vector<80x128xf32>
    %cst_5 = arith.constant dense<0.000000e+00> : vector<16x128xf32>
    %11 = tpu.matmul %8, %10, %cst_5 {dimension_numbers = #tpu.dot_dimension_numbers<[1], [0], [0], [1], [0, 0, 1, 1], [], []>} : vector<16x80xf32>, vector<80x128xf32>, vector<16x128xf32> -> vector<16x128xf32>
    %12 = arith.addf %2, %11 : vector<16x128xf32>
    %c0_i32_6 = arith.constant 0 : i32
    %13 = arith.addi %1, %c0_i32_6 : i32
    %c0_7 = arith.constant 0 : index
    %14 = arith.index_cast %13 : i32 to index
    %c0_8 = arith.constant 0 : index
    %15 = vector.load %arg2[%c0_7, %14, %c0_8] : memref<1x20x80xf32, #tpu.memory_space<vmem>>, vector<1x16x80xf32>
    %16 = vector.shape_cast %15 : vector<1x16x80xf32> to vector<16x80xf32>
    %c0_9 = arith.constant 0 : index
    %c0_10 = arith.constant 0 : index
    %c0_11 = arith.constant 0 : index
    %17 = vector.load %arg4[%c0_9, %c0_10, %c0_11] : memref<3x80x128xf32, #tpu.memory_space<vmem>>, vector<1x80x128xf32>
    %18 = vector.shape_cast %17 : vector<1x80x128xf32> to vector<80x128xf32>
    %cst_12 = arith.constant dense<0.000000e+00> : vector<16x128xf32>
    %19 = tpu.matmul %16, %18, %cst_12 {dimension_numbers = #tpu.dot_dimension_numbers<[1], [0], [0], [1], [0, 0, 1, 1], [], []>} : vector<16x80xf32>, vector<80x128xf32>, vector<16x128xf32> -> vector<16x128xf32>
    %20 = arith.addf %3, %19 : vector<16x128xf32>
    %c1_i32_13 = arith.constant 1 : i32
    %21 = arith.addi %1, %c1_i32_13 : i32
    %c1_i32_14 = arith.constant 1 : i32
    %22 = arith.addi %21, %c1_i32_14 : i32
    %c0_15 = arith.constant 0 : index
    %23 = arith.index_cast %22 : i32 to index
    %c0_16 = arith.constant 0 : index
    %24 = vector.load %arg2[%c0_15, %23, %c0_16] : memref<1x20x80xf32, #tpu.memory_space<vmem>>, vector<1x16x80xf32>
    %25 = vector.shape_cast %24 : vector<1x16x80xf32> to vector<16x80xf32>
    %c1 = arith.constant 1 : index
    %c0_17 = arith.constant 0 : index
    %c0_18 = arith.constant 0 : index
    %26 = vector.load %arg3[%c1, %c0_17, %c0_18] : memref<3x80x128xf32, #tpu.memory_space<vmem>>, vector<1x80x128xf32>
    %27 = vector.shape_cast %26 : vector<1x80x128xf32> to vector<80x128xf32>
    %cst_19 = arith.constant dense<0.000000e+00> : vector<16x128xf32>
    %28 = tpu.matmul %25, %27, %cst_19 {dimension_numbers = #tpu.dot_dimension_numbers<[1], [0], [0], [1], [0, 0, 1, 1], [], []>} : vector<16x80xf32>, vector<80x128xf32>, vector<16x128xf32> -> vector<16x128xf32>
    %29 = arith.addf %12, %28 : vector<16x128xf32>
    %c2_i32 = arith.constant 2 : i32
    %30 = arith.addi %1, %c2_i32 : i32
    %c0_20 = arith.constant 0 : index
    %31 = arith.index_cast %30 : i32 to index
    %c0_21 = arith.constant 0 : index
    %32 = vector.load %arg2[%c0_20, %31, %c0_21] : memref<1x20x80xf32, #tpu.memory_space<vmem>>, vector<1x16x80xf32>
    %33 = vector.shape_cast %32 : vector<1x16x80xf32> to vector<16x80xf32>
    %c1_22 = arith.constant 1 : index
    %c0_23 = arith.constant 0 : index
    %c0_24 = arith.constant 0 : index
    %34 = vector.load %arg4[%c1_22, %c0_23, %c0_24] : memref<3x80x128xf32, #tpu.memory_space<vmem>>, vector<1x80x128xf32>
    %35 = vector.shape_cast %34 : vector<1x80x128xf32> to vector<80x128xf32>
    %cst_25 = arith.constant dense<0.000000e+00> : vector<16x128xf32>
    %36 = tpu.matmul %33, %35, %cst_25 {dimension_numbers = #tpu.dot_dimension_numbers<[1], [0], [0], [1], [0, 0, 1, 1], [], []>} : vector<16x80xf32>, vector<80x128xf32>, vector<16x128xf32> -> vector<16x128xf32>
    %37 = arith.addf %20, %36 : vector<16x128xf32>
    %c1_i32_26 = arith.constant 1 : i32
    %38 = arith.addi %1, %c1_i32_26 : i32
    %c2_i32_27 = arith.constant 2 : i32
    %39 = arith.addi %38, %c2_i32_27 : i32
    %c0_28 = arith.constant 0 : index
    %40 = arith.index_cast %39 : i32 to index
    %c0_29 = arith.constant 0 : index
    %41 = vector.load %arg2[%c0_28, %40, %c0_29] : memref<1x20x80xf32, #tpu.memory_space<vmem>>, vector<1x16x80xf32>
    %42 = vector.shape_cast %41 : vector<1x16x80xf32> to vector<16x80xf32>
    %c2 = arith.constant 2 : index
    %c0_30 = arith.constant 0 : index
    %c0_31 = arith.constant 0 : index
    %43 = vector.load %arg3[%c2, %c0_30, %c0_31] : memref<3x80x128xf32, #tpu.memory_space<vmem>>, vector<1x80x128xf32>
    %44 = vector.shape_cast %43 : vector<1x80x128xf32> to vector<80x128xf32>
    %cst_32 = arith.constant dense<0.000000e+00> : vector<16x128xf32>
    %45 = tpu.matmul %42, %44, %cst_32 {dimension_numbers = #tpu.dot_dimension_numbers<[1], [0], [0], [1], [0, 0, 1, 1], [], []>} : vector<16x80xf32>, vector<80x128xf32>, vector<16x128xf32> -> vector<16x128xf32>
    %46 = arith.addf %29, %45 : vector<16x128xf32>
    %c4_i32 = arith.constant 4 : i32
    %47 = arith.addi %1, %c4_i32 : i32
    %c0_33 = arith.constant 0 : index
    %48 = arith.index_cast %47 : i32 to index
    %c0_34 = arith.constant 0 : index
    %49 = vector.load %arg2[%c0_33, %48, %c0_34] : memref<1x20x80xf32, #tpu.memory_space<vmem>>, vector<1x16x80xf32>
    %50 = vector.shape_cast %49 : vector<1x16x80xf32> to vector<16x80xf32>
    %c2_35 = arith.constant 2 : index
    %c0_36 = arith.constant 0 : index
    %c0_37 = arith.constant 0 : index
    %51 = vector.load %arg4[%c2_35, %c0_36, %c0_37] : memref<3x80x128xf32, #tpu.memory_space<vmem>>, vector<1x80x128xf32>
    %52 = vector.shape_cast %51 : vector<1x80x128xf32> to vector<80x128xf32>
    %cst_38 = arith.constant dense<0.000000e+00> : vector<16x128xf32>
    %53 = tpu.matmul %50, %52, %cst_38 {dimension_numbers = #tpu.dot_dimension_numbers<[1], [0], [0], [1], [0, 0, 1, 1], [], []>} : vector<16x80xf32>, vector<80x128xf32>, vector<16x128xf32> -> vector<16x128xf32>
    %54 = arith.addf %37, %53 : vector<16x128xf32>
    %c0_39 = arith.constant 0 : index
    %c0_40 = arith.constant 0 : index
    %c0_41 = arith.constant 0 : index
    %55 = vector.load %arg5[%c0_39, %c0_40, %c0_41] : memref<1x16x128xf32, #tpu.memory_space<vmem>>, vector<1x16x128xf32>
    %56 = vector.shape_cast %55 : vector<1x16x128xf32> to vector<16x128xf32>
    %57 = vector.shape_cast %46 : vector<16x128xf32> to vector<1x16x128xf32>
    tpu.vector_store %arg5[%c0_39, %c0_40, %c0_41], %57 {strides = array<i32>} : memref<1x16x128xf32, #tpu.memory_space<vmem>>, vector<1x16x128xf32>,
    %c0_42 = arith.constant 0 : index
    %c0_43 = arith.constant 0 : index
    %c0_44 = arith.constant 0 : index
    %58 = vector.load %arg6[%c0_42, %c0_43, %c0_44] : memref<1x16x128xf32, #tpu.memory_space<vmem>>, vector<1x16x128xf32>
    %59 = vector.shape_cast %58 : vector<1x16x128xf32> to vector<16x128xf32>
    %60 = vector.shape_cast %54 : vector<16x128xf32> to vector<1x16x128xf32>
    tpu.vector_store %arg6[%c0_42, %c0_43, %c0_44], %60 {strides = array<i32>} : memref<1x16x128xf32, #tpu.memory_space<vmem>>, vector<1x16x128xf32>,
    %c0_i32_45 = arith.constant 0 : i32
    %61 = arith.cmpi eq, %arg1, %c0_i32_45 : i32
    %62 = arith.extui %61 : i1 to i32
    %c0_i32_46 = arith.constant 0 : i32
    %63 = arith.cmpi ne, %62, %c0_i32_46 : i32
    scf.if %63 {
      %cst_57 = arith.constant 0.000000e+00 : f32
      %81 = vector.broadcast %cst_57 : f32 to vector<4x128xf32>
      %c0_58 = arith.constant 0 : index
      %c0_59 = arith.constant 0 : index
      %c0_60 = arith.constant 0 : index
      %82 = vector.load %arg7[%c0_58, %c0_59, %c0_60] : memref<1x4x128xf32, #tpu.memory_space<vmem>>, vector<1x4x128xf32>
      %83 = vector.shape_cast %82 : vector<1x4x128xf32> to vector<4x128xf32>
      %84 = vector.shape_cast %81 : vector<4x128xf32> to vector<1x4x128xf32>
      tpu.vector_store %arg7[%c0_58, %c0_59, %c0_60], %84 {strides = array<i32>} : memref<1x4x128xf32, #tpu.memory_space<vmem>>, vector<1x4x128xf32>,
    } else {
    }
    %c0_47 = arith.constant 0 : index
    %c0_48 = arith.constant 0 : index
    %c0_49 = arith.constant 0 : index
    %64 = vector.load %arg7[%c0_47, %c0_48, %c0_49] : memref<1x4x128xf32, #tpu.memory_space<vmem>>, vector<1x4x128xf32>
    %65 = vector.shape_cast %64 : vector<1x4x128xf32> to vector<4x128xf32>
    %cst_50 = arith.constant dense<0.000000e+00> : vector<128xf32>
    %66 = vector.multi_reduction <add>, %46, %cst_50 [0] : vector<16x128xf32> to vector<128xf32>
    %67 = vector.shape_cast %66 : vector<128xf32> to vector<1x128xf32>
    %68 = arith.mulf %46, %46 : vector<16x128xf32>
    %cst_51 = arith.constant dense<0.000000e+00> : vector<128xf32>
    %69 = vector.multi_reduction <add>, %68, %cst_51 [0] : vector<16x128xf32> to vector<128xf32>
    %70 = vector.shape_cast %69 : vector<128xf32> to vector<1x128xf32>
    %cst_52 = arith.constant dense<0.000000e+00> : vector<128xf32>
    %71 = vector.multi_reduction <add>, %54, %cst_52 [0] : vector<16x128xf32> to vector<128xf32>
    %72 = vector.shape_cast %71 : vector<128xf32> to vector<1x128xf32>
    %73 = arith.mulf %54, %54 : vector<16x128xf32>
    %cst_53 = arith.constant dense<0.000000e+00> : vector<128xf32>
    %74 = vector.multi_reduction <add>, %73, %cst_53 [0] : vector<16x128xf32> to vector<128xf32>
    %75 = vector.shape_cast %74 : vector<128xf32> to vector<1x128xf32>
    %76 = tpu.concatenate %67, %70, %72, %75 in 0 : vector<1x128xf32>, vector<1x128xf32>, vector<1x128xf32>, vector<1x128xf32> -> vector<4x128xf32>
    %77 = arith.addf %65, %76 : vector<4x128xf32>
    %c0_54 = arith.constant 0 : index
    %c0_55 = arith.constant 0 : index
    %c0_56 = arith.constant 0 : index
    %78 = vector.load %arg7[%c0_54, %c0_55, %c0_56] : memref<1x4x128xf32, #tpu.memory_space<vmem>>, vector<1x4x128xf32>
    %79 = vector.shape_cast %78 : vector<1x4x128xf32> to vector<4x128xf32>
    %80 = vector.shape_cast %77 : vector<4x128xf32> to vector<1x4x128xf32>
    tpu.vector_store %arg7[%c0_54, %c0_55, %c0_56], %80 {strides = array<i32>} : memref<1x4x128xf32, #tpu.memory_space<vmem>>, vector<1x4x128xf32>,
    return
  }
  func.func @transform_0(%arg0: i32, %arg1: i32) -> (i32, i32, i32) {
    %c0_i32 = arith.constant 0 : i32
    %c0_i32_0 = arith.constant 0 : i32
    %c0_i32_1 = arith.constant 0 : i32
    return %arg0, %c0_i32, %c0_i32_0 : i32, i32, i32
  }
  func.func @transform_1(%arg0: i32, %arg1: i32) -> (i32, i32, i32) {
    %c0_i32 = arith.constant 0 : i32
    %c0_i32_0 = arith.constant 0 : i32
    %c0_i32_1 = arith.constant 0 : i32
    %c0_i32_2 = arith.constant 0 : i32
    return %c0_i32, %c0_i32_0, %c0_i32_1 : i32, i32, i32
  }
  func.func @transform_2(%arg0: i32, %arg1: i32) -> (i32, i32, i32) {
    %c0_i32 = arith.constant 0 : i32
    %c0_i32_0 = arith.constant 0 : i32
    %c0_i32_1 = arith.constant 0 : i32
    %c0_i32_2 = arith.constant 0 : i32
    return %c0_i32, %c0_i32_0, %c0_i32_1 : i32, i32, i32
  }
  func.func @transform_3(%arg0: i32, %arg1: i32) -> (i32, i32, i32) {
    %c0_i32 = arith.constant 0 : i32
    %c0_i32_0 = arith.constant 0 : i32
    return %arg0, %arg1, %c0_i32 : i32, i32, i32
  }
  func.func @transform_4(%arg0: i32, %arg1: i32) -> (i32, i32, i32) {
    %c0_i32 = arith.constant 0 : i32
    %c0_i32_0 = arith.constant 0 : i32
    return %arg0, %arg1, %c0_i32 : i32, i32, i32
  }
  func.func @transform_5(%arg0: i32, %arg1: i32) -> (i32, i32, i32) {
    %c0_i32 = arith.constant 0 : i32
    %c0_i32_0 = arith.constant 0 : i32
    %c0_i32_1 = arith.constant 0 : i32
    return %arg0, %c0_i32, %c0_i32_0 : i32, i32, i32
  }
}

module attributes {stable_mosaic.version = 11 : i64} {
  func.func @_combine_kernel(%arg0: i32, %arg1: i32, %arg2: memref<1x16x128xf32, #tpu.memory_space<vmem>>, %arg3: memref<1x16x128xf32, #tpu.memory_space<vmem>>, %arg4: memref<1x128xf32, #tpu.memory_space<vmem>>, %arg5: memref<1x128xf32, #tpu.memory_space<vmem>>, %arg6: memref<1x128xf32, #tpu.memory_space<vmem>>, %arg7: memref<1x128xf32, #tpu.memory_space<vmem>>, %arg8: memref<128x128xf32, #tpu.memory_space<vmem>>, %arg9: memref<128x128xf32, #tpu.memory_space<vmem>>, %arg10: memref<1x16x128xf32, #tpu.memory_space<vmem>>, %arg11: memref<1x2x128xf32, #tpu.memory_space<vmem>>) attributes {dimension_semantics = [#tpu.dimension_semantics<parallel>, #tpu.dimension_semantics<arbitrary>], iteration_bounds = array<i64: 2, 1>, scalar_prefetch = 0 : i64, scratch_operands = 0 : i64, tpu.core_type = #tpu.core_type<tc>, window_params = [{transform_indices = @transform_0, window_bounds = array<i64: 1, 16, 128>}, {transform_indices = @transform_1, window_bounds = array<i64: 1, 16, 128>}, {pipeline_mode = #tpu.pipeline_mode<synchronous>, transform_indices = @transform_2, window_bounds = array<i64: 1, 128>}, {pipeline_mode = #tpu.pipeline_mode<synchronous>, transform_indices = @transform_3, window_bounds = array<i64: 1, 128>}, {pipeline_mode = #tpu.pipeline_mode<synchronous>, transform_indices = @transform_4, window_bounds = array<i64: 1, 128>}, {pipeline_mode = #tpu.pipeline_mode<synchronous>, transform_indices = @transform_5, window_bounds = array<i64: 1, 128>}, {pipeline_mode = #tpu.pipeline_mode<synchronous>, transform_indices = @transform_6, window_bounds = array<i64: 128, 128>}, {pipeline_mode = #tpu.pipeline_mode<synchronous>, transform_indices = @transform_7, window_bounds = array<i64: 128, 128>}, {transform_indices = @transform_8, window_bounds = array<i64: 1, 16, 128>}, {transform_indices = @transform_9, window_bounds = array<i64: 1, 2, 128>}]} {
    %c0 = arith.constant 0 : index
    %c0_0 = arith.constant 0 : index
    %c0_1 = arith.constant 0 : index
    %0 = vector.load %arg2[%c0, %c0_0, %c0_1] : memref<1x16x128xf32, #tpu.memory_space<vmem>>, vector<1x16x128xf32>
    %1 = vector.shape_cast %0 : vector<1x16x128xf32> to vector<16x128xf32>
    %c0_2 = arith.constant 0 : index
    %c0_3 = arith.constant 0 : index
    %2 = vector.load %arg4[%c0_2, %c0_3] : memref<1x128xf32, #tpu.memory_space<vmem>>, vector<1x128xf32>
    %3 = vector.broadcast %2 : vector<1x128xf32> to vector<16x128xf32>
    %4 = arith.mulf %1, %3 : vector<16x128xf32>
    %c0_4 = arith.constant 0 : index
    %c0_5 = arith.constant 0 : index
    %5 = vector.load %arg5[%c0_4, %c0_5] : memref<1x128xf32, #tpu.memory_space<vmem>>, vector<1x128xf32>
    %6 = vector.broadcast %5 : vector<1x128xf32> to vector<16x128xf32>
    %7 = arith.addf %4, %6 : vector<16x128xf32>
    %cst = arith.constant 0.000000e+00 : f32
    %8 = vector.broadcast %cst : f32 to vector<16x128xf32>
    %9 = arith.cmpf oge, %7, %8 : vector<16x128xf32>
    %cst_6 = arith.constant 0.00999999977 : f32
    %10 = vector.broadcast %cst_6 : f32 to vector<16x128xf32>
    %11 = arith.mulf %10, %7 : vector<16x128xf32>
    %12 = arith.select %9, %7, %11 : vector<16x128xi1>, vector<16x128xf32>
    %c0_7 = arith.constant 0 : index
    %c0_8 = arith.constant 0 : index
    %c0_9 = arith.constant 0 : index
    %13 = vector.load %arg3[%c0_7, %c0_8, %c0_9] : memref<1x16x128xf32, #tpu.memory_space<vmem>>, vector<1x16x128xf32>
    %14 = vector.shape_cast %13 : vector<1x16x128xf32> to vector<16x128xf32>
    %c0_10 = arith.constant 0 : index
    %c0_11 = arith.constant 0 : index
    %15 = vector.load %arg6[%c0_10, %c0_11] : memref<1x128xf32, #tpu.memory_space<vmem>>, vector<1x128xf32>
    %16 = vector.broadcast %15 : vector<1x128xf32> to vector<16x128xf32>
    %17 = arith.mulf %14, %16 : vector<16x128xf32>
    %c0_12 = arith.constant 0 : index
    %c0_13 = arith.constant 0 : index
    %18 = vector.load %arg7[%c0_12, %c0_13] : memref<1x128xf32, #tpu.memory_space<vmem>>, vector<1x128xf32>
    %19 = vector.broadcast %18 : vector<1x128xf32> to vector<16x128xf32>
    %20 = arith.addf %17, %19 : vector<16x128xf32>
    %cst_14 = arith.constant 0.000000e+00 : f32
    %21 = vector.broadcast %cst_14 : f32 to vector<16x128xf32>
    %22 = arith.cmpf oge, %20, %21 : vector<16x128xf32>
    %cst_15 = arith.constant 0.00999999977 : f32
    %23 = vector.broadcast %cst_15 : f32 to vector<16x128xf32>
    %24 = arith.mulf %23, %20 : vector<16x128xf32>
    %25 = arith.select %22, %20, %24 : vector<16x128xi1>, vector<16x128xf32>
    %c0_16 = arith.constant 0 : index
    %c0_17 = arith.constant 0 : index
    %26 = vector.load %arg8[%c0_16, %c0_17] : memref<128x128xf32, #tpu.memory_space<vmem>>, vector<128x128xf32>
    %cst_18 = arith.constant dense<0.000000e+00> : vector<16x128xf32>
    %27 = tpu.matmul %12, %26, %cst_18 {dimension_numbers = #tpu.dot_dimension_numbers<[1], [0], [0], [1], [0, 0, 1, 1], [], []>} : vector<16x128xf32>, vector<128x128xf32>, vector<16x128xf32> -> vector<16x128xf32>
    %c0_19 = arith.constant 0 : index
    %c0_20 = arith.constant 0 : index
    %28 = vector.load %arg9[%c0_19, %c0_20] : memref<128x128xf32, #tpu.memory_space<vmem>>, vector<128x128xf32>
    %cst_21 = arith.constant dense<0.000000e+00> : vector<16x128xf32>
    %29 = tpu.matmul %25, %28, %cst_21 {dimension_numbers = #tpu.dot_dimension_numbers<[1], [0], [0], [1], [0, 0, 1, 1], [], []>} : vector<16x128xf32>, vector<128x128xf32>, vector<16x128xf32> -> vector<16x128xf32>
    %30 = arith.addf %27, %29 : vector<16x128xf32>
    %c0_22 = arith.constant 0 : index
    %c0_23 = arith.constant 0 : index
    %c0_24 = arith.constant 0 : index
    %31 = vector.load %arg10[%c0_22, %c0_23, %c0_24] : memref<1x16x128xf32, #tpu.memory_space<vmem>>, vector<1x16x128xf32>
    %32 = vector.shape_cast %31 : vector<1x16x128xf32> to vector<16x128xf32>
    %33 = vector.shape_cast %30 : vector<16x128xf32> to vector<1x16x128xf32>
    tpu.vector_store %arg10[%c0_22, %c0_23, %c0_24], %33 {strides = array<i32>} : memref<1x16x128xf32, #tpu.memory_space<vmem>>, vector<1x16x128xf32>,
    %c0_i32 = arith.constant 0 : i32
    %34 = arith.cmpi eq, %arg1, %c0_i32 : i32
    %35 = arith.extui %34 : i1 to i32
    %c0_i32_25 = arith.constant 0 : i32
    %36 = arith.cmpi ne, %35, %c0_i32_25 : i32
    scf.if %36 {
      %cst_34 = arith.constant 0.000000e+00 : f32
      %49 = vector.broadcast %cst_34 : f32 to vector<2x128xf32>
      %c0_35 = arith.constant 0 : index
      %c0_36 = arith.constant 0 : index
      %c0_37 = arith.constant 0 : index
      %50 = vector.load %arg11[%c0_35, %c0_36, %c0_37] : memref<1x2x128xf32, #tpu.memory_space<vmem>>, vector<1x2x128xf32>
      %51 = vector.shape_cast %50 : vector<1x2x128xf32> to vector<2x128xf32>
      %52 = vector.shape_cast %49 : vector<2x128xf32> to vector<1x2x128xf32>
      tpu.vector_store %arg11[%c0_35, %c0_36, %c0_37], %52 {strides = array<i32>} : memref<1x2x128xf32, #tpu.memory_space<vmem>>, vector<1x2x128xf32>,
    } else {
    }
    %c0_26 = arith.constant 0 : index
    %c0_27 = arith.constant 0 : index
    %c0_28 = arith.constant 0 : index
    %37 = vector.load %arg11[%c0_26, %c0_27, %c0_28] : memref<1x2x128xf32, #tpu.memory_space<vmem>>, vector<1x2x128xf32>
    %38 = vector.shape_cast %37 : vector<1x2x128xf32> to vector<2x128xf32>
    %cst_29 = arith.constant dense<0.000000e+00> : vector<128xf32>
    %39 = vector.multi_reduction <add>, %30, %cst_29 [0] : vector<16x128xf32> to vector<128xf32>
    %40 = vector.shape_cast %39 : vector<128xf32> to vector<1x128xf32>
    %41 = arith.mulf %30, %30 : vector<16x128xf32>
    %cst_30 = arith.constant dense<0.000000e+00> : vector<128xf32>
    %42 = vector.multi_reduction <add>, %41, %cst_30 [0] : vector<16x128xf32> to vector<128xf32>
    %43 = vector.shape_cast %42 : vector<128xf32> to vector<1x128xf32>
    %44 = tpu.concatenate %40, %43 in 0 : vector<1x128xf32>, vector<1x128xf32> -> vector<2x128xf32>
    %45 = arith.addf %38, %44 : vector<2x128xf32>
    %c0_31 = arith.constant 0 : index
    %c0_32 = arith.constant 0 : index
    %c0_33 = arith.constant 0 : index
    %46 = vector.load %arg11[%c0_31, %c0_32, %c0_33] : memref<1x2x128xf32, #tpu.memory_space<vmem>>, vector<1x2x128xf32>
    %47 = vector.shape_cast %46 : vector<1x2x128xf32> to vector<2x128xf32>
    %48 = vector.shape_cast %45 : vector<2x128xf32> to vector<1x2x128xf32>
    tpu.vector_store %arg11[%c0_31, %c0_32, %c0_33], %48 {strides = array<i32>} : memref<1x2x128xf32, #tpu.memory_space<vmem>>, vector<1x2x128xf32>,
    return
  }
  func.func @transform_0(%arg0: i32, %arg1: i32) -> (i32, i32, i32) {
    %c0_i32 = arith.constant 0 : i32
    %c0_i32_0 = arith.constant 0 : i32
    return %arg0, %arg1, %c0_i32 : i32, i32, i32
  }
  func.func @transform_1(%arg0: i32, %arg1: i32) -> (i32, i32, i32) {
    %c0_i32 = arith.constant 0 : i32
    %c0_i32_0 = arith.constant 0 : i32
    return %arg0, %arg1, %c0_i32 : i32, i32, i32
  }
  func.func @transform_2(%arg0: i32, %arg1: i32) -> (i32, i32) {
    %c0_i32 = arith.constant 0 : i32
    %c0_i32_0 = arith.constant 0 : i32
    %c0_i32_1 = arith.constant 0 : i32
    return %c0_i32, %c0_i32_0 : i32, i32
  }
  func.func @transform_3(%arg0: i32, %arg1: i32) -> (i32, i32) {
    %c0_i32 = arith.constant 0 : i32
    %c0_i32_0 = arith.constant 0 : i32
    %c0_i32_1 = arith.constant 0 : i32
    return %c0_i32, %c0_i32_0 : i32, i32
  }
  func.func @transform_4(%arg0: i32, %arg1: i32) -> (i32, i32) {
    %c0_i32 = arith.constant 0 : i32
    %c0_i32_0 = arith.constant 0 : i32
    %c0_i32_1 = arith.constant 0 : i32
    return %c0_i32, %c0_i32_0 : i32, i32
  }
  func.func @transform_5(%arg0: i32, %arg1: i32) -> (i32, i32) {
    %c0_i32 = arith.constant 0 : i32
    %c0_i32_0 = arith.constant 0 : i32
    %c0_i32_1 = arith.constant 0 : i32
    return %c0_i32, %c0_i32_0 : i32, i32
  }
  func.func @transform_6(%arg0: i32, %arg1: i32) -> (i32, i32) {
    %c0_i32 = arith.constant 0 : i32
    %c0_i32_0 = arith.constant 0 : i32
    %c0_i32_1 = arith.constant 0 : i32
    return %c0_i32, %c0_i32_0 : i32, i32
  }
  func.func @transform_7(%arg0: i32, %arg1: i32) -> (i32, i32) {
    %c0_i32 = arith.constant 0 : i32
    %c0_i32_0 = arith.constant 0 : i32
    %c0_i32_1 = arith.constant 0 : i32
    return %c0_i32, %c0_i32_0 : i32, i32
  }
  func.func @transform_8(%arg0: i32, %arg1: i32) -> (i32, i32, i32) {
    %c0_i32 = arith.constant 0 : i32
    %c0_i32_0 = arith.constant 0 : i32
    return %arg0, %arg1, %c0_i32 : i32, i32, i32
  }
  func.func @transform_9(%arg0: i32, %arg1: i32) -> (i32, i32, i32) {
    %c0_i32 = arith.constant 0 : i32
    %c0_i32_0 = arith.constant 0 : i32
    %c0_i32_1 = arith.constant 0 : i32
    return %arg0, %c0_i32, %c0_i32_0 : i32, i32, i32
  }
}

module attributes {stable_mosaic.version = 11 : i64} {
  func.func @_bn_act_kernel(%arg0: i32, %arg1: i32, %arg2: memref<1x16x128xf32, #tpu.memory_space<vmem>>, %arg3: memref<1x128xf32, #tpu.memory_space<vmem>>, %arg4: memref<1x128xf32, #tpu.memory_space<vmem>>, %arg5: memref<1x16x128xf32, #tpu.memory_space<vmem>>) attributes {dimension_semantics = [#tpu.dimension_semantics<parallel>, #tpu.dimension_semantics<parallel>], iteration_bounds = array<i64: 2, 1>, scalar_prefetch = 0 : i64, scratch_operands = 0 : i64, tpu.core_type = #tpu.core_type<tc>, window_params = [{transform_indices = @transform_0, window_bounds = array<i64: 1, 16, 128>}, {pipeline_mode = #tpu.pipeline_mode<synchronous>, transform_indices = @transform_1, window_bounds = array<i64: 1, 128>}, {pipeline_mode = #tpu.pipeline_mode<synchronous>, transform_indices = @transform_2, window_bounds = array<i64: 1, 128>}, {transform_indices = @transform_3, window_bounds = array<i64: 1, 16, 128>}]} {
    %c0 = arith.constant 0 : index
    %c0_0 = arith.constant 0 : index
    %c0_1 = arith.constant 0 : index
    %0 = vector.load %arg2[%c0, %c0_0, %c0_1] : memref<1x16x128xf32, #tpu.memory_space<vmem>>, vector<1x16x128xf32>
    %1 = vector.shape_cast %0 : vector<1x16x128xf32> to vector<16x128xf32>
    %c0_2 = arith.constant 0 : index
    %c0_3 = arith.constant 0 : index
    %2 = vector.load %arg3[%c0_2, %c0_3] : memref<1x128xf32, #tpu.memory_space<vmem>>, vector<1x128xf32>
    %3 = vector.broadcast %2 : vector<1x128xf32> to vector<16x128xf32>
    %4 = arith.mulf %1, %3 : vector<16x128xf32>
    %c0_4 = arith.constant 0 : index
    %c0_5 = arith.constant 0 : index
    %5 = vector.load %arg4[%c0_4, %c0_5] : memref<1x128xf32, #tpu.memory_space<vmem>>, vector<1x128xf32>
    %6 = vector.broadcast %5 : vector<1x128xf32> to vector<16x128xf32>
    %7 = arith.addf %4, %6 : vector<16x128xf32>
    %cst = arith.constant 0.000000e+00 : f32
    %8 = vector.broadcast %cst : f32 to vector<16x128xf32>
    %9 = arith.cmpf oge, %7, %8 : vector<16x128xf32>
    %cst_6 = arith.constant 0.00999999977 : f32
    %10 = vector.broadcast %cst_6 : f32 to vector<16x128xf32>
    %11 = arith.mulf %10, %7 : vector<16x128xf32>
    %12 = arith.select %9, %7, %11 : vector<16x128xi1>, vector<16x128xf32>
    %c0_7 = arith.constant 0 : index
    %c0_8 = arith.constant 0 : index
    %c0_9 = arith.constant 0 : index
    %13 = vector.load %arg5[%c0_7, %c0_8, %c0_9] : memref<1x16x128xf32, #tpu.memory_space<vmem>>, vector<1x16x128xf32>
    %14 = vector.shape_cast %13 : vector<1x16x128xf32> to vector<16x128xf32>
    %15 = vector.shape_cast %12 : vector<16x128xf32> to vector<1x16x128xf32>
    tpu.vector_store %arg5[%c0_7, %c0_8, %c0_9], %15 {strides = array<i32>} : memref<1x16x128xf32, #tpu.memory_space<vmem>>, vector<1x16x128xf32>,
    return
  }
  func.func @transform_0(%arg0: i32, %arg1: i32) -> (i32, i32, i32) {
    %c0_i32 = arith.constant 0 : i32
    %c0_i32_0 = arith.constant 0 : i32
    return %arg0, %arg1, %c0_i32 : i32, i32, i32
  }
  func.func @transform_1(%arg0: i32, %arg1: i32) -> (i32, i32) {
    %c0_i32 = arith.constant 0 : i32
    %c0_i32_0 = arith.constant 0 : i32
    %c0_i32_1 = arith.constant 0 : i32
    return %c0_i32, %c0_i32_0 : i32, i32
  }
  func.func @transform_2(%arg0: i32, %arg1: i32) -> (i32, i32) {
    %c0_i32 = arith.constant 0 : i32
    %c0_i32_0 = arith.constant 0 : i32
    %c0_i32_1 = arith.constant 0 : i32
    return %c0_i32, %c0_i32_0 : i32, i32
  }
  func.func @transform_3(%arg0: i32, %arg1: i32) -> (i32, i32, i32) {
    %c0_i32 = arith.constant 0 : i32
    %c0_i32_0 = arith.constant 0 : i32
    return %arg0, %arg1, %c0_i32 : i32, i32, i32
  }
}

</mosaic_0001>

<bundles_post_ra>
// kernel: tile.33
= control target key start
LH: loop header
LB: loop body
LE: loop exit
PB: predicated region body
PF: predicated region fallthrough
CT: control target
= control target key end

     0   :  { %s28_s0 = inlined_call_operand.vmem [shape: f32[8], index: 0, kind: input, shape index: {}]   ;;  %s29_s1 = inlined_call_operand.vmem [shape: f32[16,8], index: 1, kind: output, shape index: {}]  }
   0x1   :  { %v4_v0 = vld [vmem:[%s28_s0] ss:$0 sm:$0xff] }
   0x2   :  { %5 = vst [vmem:[%s29_s1] sm:$0xff] %v4_v0  ;;  %8 = vst [vmem:[%s29_s1 + $0x8] sm:$0xff] %v4_v0 }

// kernel: tile.34
= control target key start
LH: loop header
LB: loop body
LE: loop exit
PB: predicated region body
PF: predicated region fallthrough
CT: control target
= control target key end

     0   :  { %s131_s10 = smov 120   ;;  %s132_s11 = smov 104   ;;  %vm3_vm0 = vcmask 64512   ;;  %vm9_vm1 = vcmask 1048512   ;;  %vm15_vm2 = vcmask 982912   ;;  %vm21_vm3 = vcmask 917312   ;;  %s207_s0 = inlined_call_operand.vmem [shape: f32[16,8], index: 0, kind: input, shape index: {}]   ;;  %s208_s1 = inlined_call_operand.vmem [shape: f32[1,128], index: 1, kind: output, shape index: {}]  }
   0x1   :  { %v101_v0 = vld [vmem:[%s207_s0 + $0xf] sm:$0x1]   ;;  %v103_v1 = vld [vmem:[%s207_s0 + $0xd] sm:$0x1]   ;;  %v102_v2 = vld [vmem:[%s207_s0 + $0xe] sm:$0x1]  }
   0x2   :  { %7 = vrot.lane.b32.xlu0 %v101_v0, %s131_s10  ;;  %19 = vrot.lane.b32.xlu1 %v103_v1, %s132_s11  ;;  %v104_v3 = vld [vmem:[%s207_s0 + $0xc] sm:$0x1]   ;;  %s133_s16 = smov 112   ;;  %s134_s17 = smov 96   ;;  %v105_v4 = vld [vmem:[%s207_s0 + $0xb] sm:$0x1]  }
   0x3   :  { %v106_v5 = vld [vmem:[%s207_s0 + $0xa] sm:$0x1]   ;;  %v2_v6 = vld [vmem:[%s207_s0] sm:$0x1]   ;;  %s135_s24 = smov 88   ;;  %s136_s25 = smov 80  }
   0x4   :  { %4 = vst.msk [vmem:[#allocation0] sm:$0x1] %vm3_vm0, %v2_v6   ;;  %v107_v7 = vld [vmem:[%s207_s0 + $0x9] sm:$0x1]   ;;  %v108_v8 = vld [vmem:[%s207_s0 + $0x8] sm:$0x1]  }
   0x5   :  { %s137_s30 = smov 72   ;;  %s138_s2 = smov 64   ;;  %v109_v9 = vld [vmem:[%s207_s0 + $0x7] sm:$0x1]   ;;  %v110_v10 = vld [vmem:[%s207_s0 + $0x6] sm:$0x1]  }
   0x6   :  { %13 = vrot.lane.b32.xlu0 %v102_v2, %s133_s16  ;;  %25 = vrot.lane.b32.xlu1 %v104_v3, %s134_s17  ;;  %s139_s7 = smov 56   ;;  %s140_s8 = smov 48   ;;  %v111_v11 = vld [vmem:[%s207_s0 + $0x5] sm:$0x1]   ;;  %v112_v12 = vld [vmem:[%s207_s0 + $0x4] sm:$0x1]  }
   0x7   :  { %s141_s13 = smov 40   ;;  %s142_s14 = smov 32   ;;  %v113_v13 = vld [vmem:[%s207_s0 + $0x3] sm:$0x1]   ;;  %v114_v14 = vld [vmem:[%s207_s0 + $0x2] sm:$0x1]  }
   0x8   :  { %s143_s19 = smov 24   ;;  %s144_s20 = smov 16   ;;  %v115_v15 = vld [vmem:[%s207_s0 + $0x1] sm:$0x1]   ;;  %vm27_vm4 = vcmask 851712   ;;  %vm33_vm5 = vcmask 786112  }
   0x9   :  { %s145_s0 = smov 8   ;;  %vm39_vm6 = vcmask 720512   ;;  %vm45_vm7 = vcmask 654912   ;;  %vm51_vm8 = vcmask 589312   ;;  %vm57_vm9 = vcmask 523712  }
   0xa   :  { %31 = vrot.lane.b32.xlu0 %v105_v4, %s135_s24  ;;  %37 = vrot.lane.b32.xlu1 %v106_v5, %s136_s25  ;;  %vm63_vm10 = vcmask 458112   ;;  %vm69_vm11 = vcmask 392512   ;;  %vm75_vm12 = vcmask 326912   ;;  %vm81_vm13 = vcmask 261312  }
   0xb   :  { %vm87_vm14 = vcmask 195712   ;;  %vm93_vm15 = vcmask 130112  }
   0xe   :  { %43 = vrot.lane.b32.xlu0 %v107_v7, %s137_s30  ;;  %49 = vrot.lane.b32.xlu1 %v108_v8, %s138_s2 }
  0x12   :  { %55 = vrot.lane.b32.xlu0 %v109_v9, %s139_s7  ;;  %61 = vrot.lane.b32.xlu1 %v110_v10, %s140_s8 }
  0x16   :  { %67 = vrot.lane.b32.xlu0 %v111_v11, %s141_s13  ;;  %73 = vrot.lane.b32.xlu1 %v112_v12, %s142_s14 }
  0x1a   :  { %79 = vrot.lane.b32.xlu0 %v113_v13, %s143_s19  ;;  %85 = vrot.lane.b32.xlu1 %v114_v14, %s144_s20 }
  0x1e   :  { %91 = vrot.lane.b32.xlu0 %v115_v15, %s145_s0 }
  0x74   :  { %v8_v16 = vpop.permute.xlu0 %7   ;;  %v20_v17 = vpop.permute.xlu1 %19  }
  0x75   :  { %10 = vst.msk [vmem:[#allocation0] sm:$0x1] %vm9_vm1, %v8_v16  }
  0x78   :  { %v14_v18 = vpop.permute.xlu0 %13   ;;  %v26_v19 = vpop.permute.xlu1 %25  }
  0x79   :  { %16 = vst.msk [vmem:[#allocation0] sm:$0x1] %vm15_vm2, %v14_v18  }
  0x7a   :  { %22 = vst.msk [vmem:[#allocation0] sm:$0x1] %vm21_vm3, %v20_v17  }
  0x7b   :  { %28 = vst.msk [vmem:[#allocation0] sm:$0x1] %vm27_vm4, %v26_v19  }
  0x7c   :  { %v32_v20 = vpop.permute.xlu0 %31   ;;  %v38_v21 = vpop.permute.xlu1 %37  }
  0x7d   :  { %34 = vst.msk [vmem:[#allocation0] sm:$0x1] %vm33_vm5, %v32_v20  }
  0x7e   :  { %40 = vst.msk [vmem:[#allocation0] sm:$0x1] %vm39_vm6, %v38_v21  }
  0x80   :  { %v44_v22 = vpop.permute.xlu0 %43   ;;  %v50_v23 = vpop.permute.xlu1 %49  }
  0x81   :  { %46 = vst.msk [vmem:[#allocation0] sm:$0x1] %vm45_vm7, %v44_v22  }
  0x82   :  { %52 = vst.msk [vmem:[#allocation0] sm:$0x1] %vm51_vm8, %v50_v23  }
  0x84   :  { %v56_v24 = vpop.permute.xlu0 %55   ;;  %v62_v25 = vpop.permute.xlu1 %61  }
  0x85   :  { %58 = vst.msk [vmem:[#allocation0] sm:$0x1] %vm57_vm9, %v56_v24  }
  0x86   :  { %64 = vst.msk [vmem:[#allocation0] sm:$0x1] %vm63_vm10, %v62_v25  }
  0x88   :  { %v68_v26 = vpop.permute.xlu0 %67   ;;  %v74_v27 = vpop.permute.xlu1 %73  }
  0x89   :  { %70 = vst.msk [vmem:[#allocation0] sm:$0x1] %vm69_vm11, %v68_v26  }
  0x8a   :  { %76 = vst.msk [vmem:[#allocation0] sm:$0x1] %vm75_vm12, %v74_v27  }
  0x8c   :  { %v80_v28 = vpop.permute.xlu0 %79   ;;  %v86_v29 = vpop.permute.xlu1 %85  }
  0x8d   :  { %82 = vst.msk [vmem:[#allocation0] sm:$0x1] %vm81_vm13, %v80_v28  }
  0x8e   :  { %88 = vst.msk [vmem:[#allocation0] sm:$0x1] %vm87_vm14, %v86_v29  }
  0x90   :  { %v92_v30 = vpop.permute.xlu0 %91  }
  0x91   :  { %94 = vst.msk [vmem:[#allocation0] sm:$0x1] %vm93_vm15, %v92_v30  }
  0x98   :  { %v98_v31 = vld [vmem:[#allocation0] sm:$0x1] }
  0x99   :  { %100 = vst [vmem:[%s208_s1] sm:$0x1] %v98_v31 }

// kernel: conv_module_forward.3
= control target key start
LH: loop header
LB: loop body
LE: loop exit
PB: predicated region body
PF: predicated region fallthrough
CT: control target
= control target key end

     0   :  { %s1571_s18 = smov 0   ;;  %s1573_s19 = smov 0   ;;  %s1824_s0 = inlined_call_operand.vmem [shape: f32[2,20,80], index: 0, kind: input, shape index: {}]   ;;  %s1825_s1 = inlined_call_operand.vmem [shape: f32[3,80,128], index: 1, kind: input, shape index: {}]   ;;  %s1826_s2 = inlined_call_operand.vmem [shape: f32[3,80,128], index: 2, kind: input, shape index: {}]   ;;  %s1827_s3 = inlined_call_operand.vmem [shape: f32[2,16,128], index: 3, kind: output, shape index: {0}]   ;;  %s1828_s4 = inlined_call_operand.vmem [shape: f32[2,16,128], index: 4, kind: output, shape index: {1}]   ;;  %s1829_s5 = inlined_call_operand.vmem [shape: f32[2,4,128], index: 5, kind: output, shape index: {2}]  }
   0x1   :  { %s1575_s20 = smov 0  }
   0x2 LB: > { %s28_s21 = sadd.s32 1, %s1534_s19  ;;  %p1081_p0 = scmp.ge.s32.totalorder %s1538_s20, 1  ;;  %s1538_s20 = sphi %s1575_s20, %s16_s20   ;;  %s1534_s19 = sphi %s1573_s19, %s1831_s19   ;;  %s1530_s18 = sphi %s1571_s18, %s1830_s18  }
   0x3   : > { %p30_p1 = scmp.ge.s32.totalorder %s28_s21, 2  ;;  %p208_p2 = scmp.lt.s32.totalorder %s1538_s20, 3 }
   0x5   : > { %s1833_s21 = smov (%p30_p1, %s28_s21), 0  ;;  %p209_p3 = pnand %p1081_p0, %p208_p2 }
   0x6   : > { %v1092_v0 = vld [vmem:[%s1825_s1 + $0x50] sm:$0xff] (!%p209_p3)  ;;  %v1093_v1 = vld [vmem:[%s1825_s1 + $0x58] sm:$0xff] (!%p209_p3)  ;;  %p253_p4 = scmp.lt.s32.totalorder (!%p209_p3), %s1530_s18, 1  ;;  %v1094_v5 = vld [vmem:[%s1825_s1 + $0x60] sm:$0xff] (!%p209_p3)  ;;  %vm325_vm0 = vcmask (!%p209_p3), 654336   ;;  %vm893_vm1 = vcmask (!%p209_p3), 1040384  }
   0x7   : > { %212 = sbr.rel (%p209_p3) target bundleno = 304 (0x130), region = 32  ;;  %v1106_v2 = vld [vmem:[%s1826_s2 + $0x50] sm:$0xff] (!%p209_p3)  ;;  %v1362_v3 = vpack.c.bf16 (!%p209_p3), %v1093_v1, %v1092_v0  ;;  %v1107_v4 = vld [vmem:[%s1826_s2 + $0x58] sm:$0xff] (!%p209_p3)  ;;  %v1095_v6 = vld [vmem:[%s1825_s1 + $0x68] sm:$0xff] (!%p209_p3)  ;;  %vm895_vm2 = vcmask (!%p209_p3), 1041408   ;;  %vm897_vm3 = vcmask (!%p209_p3), 1042432  }
   0x8   : > { %v1402_v7 = vpack.c.bf16 (!%p209_p3), %v1107_v4, %v1106_v2  ;;  %v1366_v8 = vpack.c.bf16 (!%p209_p3), %v1095_v6, %v1094_v5  ;;  %v1108_v9 = vld [vmem:[%s1826_s2 + $0x60] sm:$0xff] (!%p209_p3)  ;;  %v1109_v10 = vld [vmem:[%s1826_s2 + $0x68] sm:$0xff] (!%p209_p3)  ;;  %v1096_v11 = vld [vmem:[%s1825_s1 + $0x70] sm:$0xff] (!%p209_p3) }
   0x9   : > { %1363 = vmatprep.subr.bf16.mxu0 (!%p209_p3), %v1362_v3  ;;  %v1406_v12 = vpack.c.bf16 (!%p209_p3), %v1109_v10, %v1108_v9  ;;  %v1097_v13 = vld [vmem:[%s1825_s1 + $0x78] sm:$0xff] (!%p209_p3)  ;;  %v1110_v14 = vld [vmem:[%s1826_s2 + $0x70] sm:$0xff] (!%p209_p3)  ;;  %v1098_v18 = vld [vmem:[%s1825_s1 + $0x80] sm:$0xff] (!%p209_p3) }
   0xa   : > { %v1111_v15 = vld [vmem:[%s1826_s2 + $0x78] sm:$0xff] (!%p209_p3)  ;;  %1403 = vmatprep.subr.bf16.mxu1 (!%p209_p3), %v1402_v7  ;;  %1365 = vmatpush3.bf16.msra.mxu0 (!%p209_p3), %v1362_v3  ;;  %v1370_v16 = vpack.c.bf16 (!%p209_p3), %v1097_v13, %v1096_v11  ;;  %v1099_v19 = vld [vmem:[%s1825_s1 + $0x88] sm:$0xff] (!%p209_p3)  ;;  %v1112_v20 = vld [vmem:[%s1826_s2 + $0x80] sm:$0xff] (!%p209_p3) }
   0xb   : > { %1405 = vmatpush3.bf16.msra.mxu1 (!%p209_p3), %v1402_v7  ;;  %1367 = vmatprep.subr.bf16.mxu0 (!%p209_p3), %v1366_v8  ;;  %v1410_v17 = vpack.c.bf16 (!%p209_p3), %v1111_v15, %v1110_v14  ;;  %v1113_v21 = vld [vmem:[%s1826_s2 + $0x88] sm:$0xff] (!%p209_p3)  ;;  %v1374_v23 = vpack.c.bf16 (!%p209_p3), %v1099_v19, %v1098_v18  ;;  %v1100_v25 = vld [vmem:[%s1825_s1 + $0x90] sm:$0xff] (!%p209_p3)  ;;  %v1101_v26 = vld [vmem:[%s1825_s1 + $0x98] sm:$0xff] (!%p209_p3) }
   0xc   : > { %1407 = vmatprep.subr.bf16.mxu1 (!%p209_p3), %v1406_v12  ;;  %v1414_v24 = vpack.c.bf16 (!%p209_p3), %v1113_v21, %v1112_v20  ;;  %v1114_v27 = vld [vmem:[%s1826_s2 + $0x90] sm:$0xff] (!%p209_p3)  ;;  %v1115_v28 = vld [vmem:[%s1826_s2 + $0x98] sm:$0xff] (!%p209_p3)  ;;  %v1378_v29 = vpack.c.bf16 (!%p209_p3), %v1101_v26, %v1100_v25  ;;  %v287_v31 = vld [vmem:[%s1825_s1] sm:$0xff] (!%p209_p3) }
   0xd   : > { %v1418_v30 = vpack.c.bf16 (!%p209_p3), %v1115_v28, %v1114_v27  ;;  %v288_v32 = vld [vmem:[%s1825_s1 + $0x8] sm:$0xff] (!%p209_p3)  ;;  %v300_v33 = vld [vmem:[%s1826_s2] sm:$0xff] (!%p209_p3)  ;;  %v289_v37 = vld [vmem:[%s1825_s1 + $0x10] sm:$0xff] (!%p209_p3) }
   0xe   : > { %s1835_s18 = smov (!%p253_p4, %s1530_s18), 1  ;;  %1369 = vmatpush3.bf16.msra.mxu0 %v1366_v8  ;;  %v301_v34 = vld [vmem:[%s1826_s2 + $0x8] sm:$0xff]  ;;  %v1382_v35 = vpack.c.bf16 %v288_v32, %v287_v31  ;;  %v290_v38 = vld [vmem:[%s1825_s1 + $0x18] sm:$0xff]  ;;  %v302_v39 = vld [vmem:[%s1826_s2 + $0x10] sm:$0xff] }
   0xf   : > { %s1490_s25 = smul.u32 24, %s1835_s18  ;;  %1409 = vmatpush3.bf16.msra.mxu1 %v1406_v12  ;;  %1371 = vmatprep.subr.bf16.mxu0 %v1370_v16  ;;  %v1422_v36 = vpack.c.bf16 %v301_v34, %v300_v33  ;;  %v303_v40 = vld [vmem:[%s1826_s2 + $0x18] sm:$0xff]  ;;  %v1386_v42 = vpack.c.bf16 %v290_v38, %v289_v37  ;;  %v291_v44 = vld [vmem:[%s1825_s1 + $0x20] sm:$0xff]  ;;  %v292_v45 = vld [vmem:[%s1825_s1 + $0x28] sm:$0xff]  ;;  %s1087_s24 = sshll.u32 %s1835_s18, 2 }
  0x10   : > { %1411 = vmatprep.subr.bf16.mxu1 %v1410_v17  ;;  %v1426_v43 = vpack.c.bf16 %v303_v40, %v302_v39  ;;  %v304_v46 = vld [vmem:[%s1826_s2 + $0x20] sm:$0xff]  ;;  %v305_v47 = vld [vmem:[%s1826_s2 + $0x28] sm:$0xff]  ;;  %v1390_v50 = vpack.c.bf16 %v292_v45, %v291_v44  ;;  %v293_v52 = vld [vmem:[%s1825_s1 + $0x30] sm:$0xff]  ;;  %s1803_s27 = scalar_lea.vmem %s1829_s5, %s1087_s24  ;;  %s1150_s28 = sshll.u32 %s1835_s18, 4 }
  0x11   : > { %s1637_s7 = scalar_lea.vmem %s1824_s0, %s1490_s25  ;;  %v1430_v51 = vpack.c.bf16 %v305_v47, %v304_v46  ;;  %v294_v53 = vld [vmem:[%s1825_s1 + $0x38] sm:$0xff]  ;;  %v306_v54 = vld [vmem:[%s1826_s2 + $0x30] sm:$0xff]  ;;  %v295_v58 = vld [vmem:[%s1825_s1 + $0x40] sm:$0xff]  ;;  %s266_s6 = scalar_lea.vmem %s1827_s3, %s1150_s28 }
  0x12   : > { %v1090_v22 = vld [vmem:[%s1637_s7 + $0x2] sm:$0xff]  ;;  %1373 = vmatpush3.bf16.msra.mxu0 %v1370_v16  ;;  %v1091_v41 = vld [vmem:[%s1637_s7 + $0xa] sm:$0xff]  ;;  %v307_v55 = vld [vmem:[%s1826_s2 + $0x38] sm:$0xff]  ;;  %v1394_v56 = vpack.c.bf16 %v294_v53, %v293_v52  ;;  %s276_s9 = scalar_lea.vmem %s1828_s4, %s1150_s28 }
  0x13   : > { %1244 = vmatprep.mubr.msk.f32.mxu0 %vm325_vm0, %v1090_v22  ;;  %1290 = vmatprep.mubr.msk.f32.mxu1 %vm325_vm0, %v1090_v22  ;;  %v1088_v48 = vld [vmem:[%s1637_s7 + $0x1] sm:$0xff]  ;;  %v1434_v57 = vpack.c.bf16 %v307_v55, %v306_v54  ;;  %v1124_v6 = vld [vmem:[%s1825_s1 + $0xb0] sm:$0xff]  ;;  %v1125_v7 = vld [vmem:[%s1825_s1 + $0xb8] sm:$0xff] }
  0x14   : > { %1413 = vmatpush3.bf16.msra.mxu1 %v1410_v17  ;;  %1375 = vmatprep.subr.bf16.mxu0 %v1374_v23  ;;  %v298_v49 = vld [vmem:[%s1637_s7] sm:$0xff]  ;;  %v296_v59 = vld [vmem:[%s1825_s1 + $0x48] sm:$0xff]  ;;  %v1138_v8 = vld [vmem:[%s1826_s2 + $0xb0] sm:$0xff]  ;;  %v1446_v12 = vpack.c.bf16 %v1125_v7, %v1124_v6 }
  0x15   : > { %1415 = vmatprep.subr.bf16.mxu1 %v1414_v24  ;;  %v308_v60 = vld [vmem:[%s1826_s2 + $0x40] sm:$0xff]  ;;  %v309_v61 = vld [vmem:[%s1826_s2 + $0x48] sm:$0xff]  ;;  %v1398_v62 = vpack.c.bf16 %v296_v59, %v295_v58  ;;  %v1139_v9 = vld [vmem:[%s1826_s2 + $0xb8] sm:$0xff] }
  0x16   : > { %1377 = vmatpush3.bf16.msra.mxu0 %v1374_v23  ;;  %v1438_v63 = vpack.c.bf16 %v309_v61, %v308_v60  ;;  %v1122_v0 = vld [vmem:[%s1825_s1 + $0xa0] sm:$0xff]  ;;  %v1123_v1 = vld [vmem:[%s1825_s1 + $0xa8] sm:$0xff]  ;;  %v1466_v13 = vpack.c.bf16 %v1139_v9, %v1138_v8  ;;  %v1128_v22 = vld [vmem:[%s1825_s1 + $0xd0] sm:$0xff] }
  0x17   : > { %1379 = vmatprep.subr.bf16.mxu0 %v1378_v29  ;;  %v1136_v2 = vld [vmem:[%s1826_s2 + $0xa0] sm:$0xff]  ;;  %v1137_v3 = vld [vmem:[%s1826_s2 + $0xa8] sm:$0xff]  ;;  %v1442_v4 = vpack.c.bf16 %v1123_v1, %v1122_v0  ;;  %v1129_v23 = vld [vmem:[%s1825_s1 + $0xd8] sm:$0xff] }
  0x18   : > { %1417 = vmatpush3.bf16.msra.mxu1 %v1414_v24  ;;  %v1462_v5 = vpack.c.bf16 %v1137_v3, %v1136_v2  ;;  %v1089_v10 = vld [vmem:[%s1637_s7 + $0x9] sm:$0xff]  ;;  %v1126_v14 = vld [vmem:[%s1825_s1 + $0xc0] sm:$0xff]  ;;  %v1143_v25 = vld [vmem:[%s1826_s2 + $0xd8] sm:$0xff]  ;;  %v1454_v26 = vpack.c.bf16 %v1129_v23, %v1128_v22 }
  0x19   : > { %1419 = vmatprep.subr.bf16.mxu1 %v1418_v30  ;;  %v299_v11 = vld [vmem:[%s1637_s7 + $0x8] sm:$0xff]  ;;  %v1140_v16 = vld [vmem:[%s1826_s2 + $0xc0] sm:$0xff]  ;;  %v1142_v24 = vld [vmem:[%s1826_s2 + $0xd0] sm:$0xff] }
  0x1a   : > { %1381 = vmatpush3.bf16.msra.mxu0 %v1378_v29  ;;  %v1127_v15 = vld [vmem:[%s1825_s1 + $0xc8] sm:$0xff]  ;;  %v1474_v27 = vpack.c.bf16 %v1143_v25, %v1142_v24  ;;  %v1130_v28 = vld [vmem:[%s1825_s1 + $0xe0] sm:$0xff] }
  0x1b   : > { %1383 = vmatprep.subr.bf16.mxu0 %v1382_v35  ;;  %v1141_v17 = vld [vmem:[%s1826_s2 + $0xc8] sm:$0xff]  ;;  %v1450_v20 = vpack.c.bf16 %v1127_v15, %v1126_v14 }
  0x1c   : > { %1421 = vmatpush3.bf16.msra.mxu1 %v1418_v30  ;;  %v1120_v18 = vld [vmem:[%s1637_s7 + $0x3] sm:$0xff]  ;;  %v1470_v21 = vpack.c.bf16 %v1141_v17, %v1140_v16  ;;  %v1121_v34 = vld [vmem:[%s1637_s7 + $0xb] sm:$0xff] }
  0x1d   : > { %1423 = vmatprep.subr.bf16.mxu1 %v1422_v36  ;;  %1245 = vmatmul.mubr.msk.f32.vlgmr.msra.gmra.mrb[0].mxu0 %vm325_vm0, %v1091_v41  ;;  %v1134_v19 = vld [vmem:[%s1637_s7 + $0x4] sm:$0xff] }
  0x1e   : > { %1385 = vmatpush3.bf16.msra.mxu0 %v1382_v35  ;;  %1267 = vmatprep.mubr.msk.f32.mxu0 %vm325_vm0, %v1088_v48  ;;  %v1131_v29 = vld [vmem:[%s1825_s1 + $0xe8] sm:$0xff]  ;;  %v1144_v30 = vld [vmem:[%s1826_s2 + $0xe0] sm:$0xff] }
  0x1f   : > { %1291 = vmatmul.mubr.msk.f32.vlgmr.msra.gmra.mrb[0].mxu1 %vm325_vm0, %v1091_v41  ;;  %1387 = vmatprep.subr.bf16.mxu0 %v1386_v42  ;;  %v1145_v31 = vld [vmem:[%s1826_s2 + $0xe8] sm:$0xff]  ;;  %v1458_v32 = vpack.c.bf16 %v1131_v29, %v1130_v28 }
  0x20   : > { %1425 = vmatpush3.bf16.msra.mxu1 %v1422_v36  ;;  %1313 = vmatprep.mubr.msk.f32.mxu1 %vm325_vm0, %v298_v49  ;;  %v1478_v33 = vpack.c.bf16 %v1145_v31, %v1144_v30  ;;  %v1135_v35 = vld [vmem:[%s1637_s7 + $0xc] sm:$0xff]  ;;  %v1540_v36 = vmov 0.0  }
  0x21   : > { %1427 = vmatprep.subr.bf16.mxu1 %v1426_v43  ;;  %859 = vst [vmem:[%s1803_s27] sm:$0xf] %v1540_v36 }
  0x22   : > { %1389 = vmatpush3.bf16.msra.mxu0 %v1386_v42 }
  0x23   : > { %1391 = vmatprep.subr.bf16.mxu0 %v1390_v50 }
  0x24   : > { %1429 = vmatpush3.bf16.msra.mxu1 %v1426_v43 }
  0x25   : > { %1431 = vmatprep.subr.bf16.mxu1 %v1430_v51 }
  0x26   : > { %1393 = vmatpush3.bf16.msra.mxu0 %v1390_v50 }
  0x27   : > { %1395 = vmatprep.subr.bf16.mxu0 %v1394_v56 }
  0x28   : > { %1433 = vmatpush3.bf16.msra.mxu1 %v1430_v51  ;;  %v860_v9 = vld [vmem:[%s1803_s27] sm:$0xf] }
  0x29   : > { %1435 = vmatprep.subr.bf16.mxu1 %v1434_v57 }
  0x2a   : > { %1397 = vmatpush3.bf16.msra.mxu0 %v1394_v56 }
  0x2b   : > { %1399 = vmatprep.subr.bf16.mxu0 %v1398_v62 }
  0x2c   : > { %1437 = vmatpush3.bf16.msra.mxu1 %v1434_v57 }
  0x2d   : > { %1439 = vmatprep.subr.bf16.mxu1 %v1438_v63 }
  0x2e   : > { %1401 = vmatpush3.bf16.msra.mxu0 %v1398_v62 }
  0x2f   : > { %1443 = vmatprep.subr.bf16.mxu0 %v1442_v4 }
  0x30   : > { %1441 = vmatpush3.bf16.msra.mxu1 %v1438_v63 }
  0x31   : > { %1463 = vmatprep.subr.bf16.mxu1 %v1462_v5  ;;  %1268 = vmatmul.mubr.msk.f32.vlgmr.msra.gmra.mrb[0].mxu0 %vm325_vm0, %v1089_v10 }
  0x32   : > { %1445 = vmatpush3.bf16.msra.mxu0 %v1442_v4  ;;  %1336 = vmatprep.mubr.msk.f32.mxu0 %vm325_vm0, %v1120_v18 }
  0x33   : > { %1314 = vmatmul.mubr.msk.f32.vlgmr.msra.gmra.mrb[0].mxu1 %vm325_vm0, %v299_v11  ;;  %1447 = vmatprep.subr.bf16.mxu0 %v1446_v12 }
  0x34   : > { %1465 = vmatpush3.bf16.msra.mxu1 %v1462_v5  ;;  %1359 = vmatprep.mubr.msk.f32.mxu1 %vm325_vm0, %v1134_v19 }
  0x35   : > { %1467 = vmatprep.subr.bf16.mxu1 %v1466_v13 }
  0x36   : > { %1449 = vmatpush3.bf16.msra.mxu0 %v1446_v12 }
  0x37   : > { %1451 = vmatprep.subr.bf16.mxu0 %v1450_v20 }
  0x38   : > { %1469 = vmatpush3.bf16.msra.mxu1 %v1466_v13 }
  0x39   : > { %1471 = vmatprep.subr.bf16.mxu1 %v1470_v21 }
  0x3a   : > { %1453 = vmatpush3.bf16.msra.mxu0 %v1450_v20 }
  0x3b   : > { %1455 = vmatprep.subr.bf16.mxu0 %v1454_v26 }
  0x3c   : > { %1473 = vmatpush3.bf16.msra.mxu1 %v1470_v21 }
  0x3d   : > { %1475 = vmatprep.subr.bf16.mxu1 %v1474_v27 }
  0x3e   : > { %1457 = vmatpush3.bf16.msra.mxu0 %v1454_v26 }
  0x3f   : > { %1459 = vmatprep.subr.bf16.mxu0 %v1458_v32 }
  0x40   : > { %1477 = vmatpush3.bf16.msra.mxu1 %v1474_v27 }
  0x41   : > { %1479 = vmatprep.subr.bf16.mxu1 %v1478_v33 }
  0x42   : > { %1461 = vmatpush3.bf16.msra.mxu0 %v1458_v32 }
  0x44   : > { %1481 = vmatpush3.bf16.msra.mxu1 %v1478_v33 }
  0x45   : > { %1337 = vmatmul.mubr.msk.f32.vlgmr.msra.gmra.mrb[0].mxu0 %vm325_vm0, %v1121_v34 }
  0x47   : > { %1360 = vmatmul.mubr.msk.f32.vlgmr.msra.gmra.mrb[0].mxu1 %vm325_vm0, %v1135_v35 }
 0x118   : > { %v1338_v37 = vpop.f32.mrb[0].mxu0 }
 0x119   : > { %v869_v38 = vmul.f32 %v1338_v37, %v1338_v37  ;;  %v742_v40 = vpop.f32.mrb[1].mxu0  ;;  %852 = vst [vmem:[%s266_s6 + $0x8] sm:$0xff] %v1338_v37 }
 0x11a   : > { %v1361_v39 = vpop.f32.mrb[0].mxu1  ;;  %851 = vst [vmem:[%s266_s6] sm:$0xff] %v742_v40  ;;  %v861_v42 = vadd.f32 %v1338_v37, %v742_v40  ;;  %v868_v43 = vmul.f32 %v742_v40, %v742_v40 }
 0x11b   : > { %v885_v41 = vmul.f32 %v1361_v39, %v1361_v39  ;;  %v840_v44 = vpop.f32.mrb[1].mxu1  ;;  %854 = vst [vmem:[%s276_s9 + $0x8] sm:$0xff] %v1361_v39 }
 0x11c   : > { %853 = vst [vmem:[%s276_s9] sm:$0xff] %v840_v44  ;;  %v877_v45 = vadd.f32 %v1361_v39, %v840_v44  ;;  %v884_v46 = vmul.f32 %v840_v44, %v840_v44  ;;  %v862_v47 = vrot.slane %v861_v42, 4  ;;  %v870_v48 = vadd.f32 %v869_v38, %v868_v43 }
 0x11e   : > { %v878_v49 = vrot.slane %v877_v45, 4  ;;  %v886_v50 = vadd.f32 %v885_v41, %v884_v46  ;;  %v863_v51 = vadd.f32 %v862_v47, %v861_v42  ;;  %v871_v52 = vrot.slane %v870_v48, 4 }
 0x120   : > { %v879_v53 = vadd.f32 %v878_v49, %v877_v45  ;;  %v887_v54 = vrot.slane %v886_v50, 4  ;;  %v864_v55 = vrot.slane %v863_v51, 2  ;;  %v872_v56 = vadd.f32 %v871_v52, %v870_v48 }
 0x122   : > { %v880_v57 = vrot.slane %v879_v53, 2  ;;  %v888_v58 = vadd.f32 %v887_v54, %v886_v50  ;;  %v865_v59 = vadd.f32 %v864_v55, %v863_v51  ;;  %v873_v60 = vrot.slane %v872_v56, 2 }
 0x124   : > { %v881_v61 = vadd.f32 %v880_v57, %v879_v53  ;;  %v889_v62 = vrot.slane %v888_v58, 2  ;;  %v866_v63 = vrot.slane %v865_v59, 1  ;;  %v874_v0 = vadd.f32 %v873_v60, %v872_v56 }
 0x126   : > { %v882_v1 = vrot.slane %v881_v61, 1  ;;  %v890_v2 = vadd.f32 %v889_v62, %v888_v58  ;;  %v875_v3 = vrot.slane %v874_v0, 1  ;;  %v867_v5 = vadd.f32 %v866_v63, %v865_v59 }
 0x128   : > { %v891_v4 = vrot.slane %v890_v2, 1  ;;  %v876_v6 = vadd.f32 %v875_v3, %v874_v0  ;;  %v883_v7 = vadd.f32 %v882_v1, %v881_v61 }
 0x12a   : > { %v894_v8 = vsel %vm893_vm1, %v867_v5, %v876_v6  ;;  %v892_v10 = vadd.f32 %v891_v4, %v890_v2 }
 0x12b   : > { %v896_v11 = vsel %vm895_vm2, %v894_v8, %v883_v7 }
 0x12c   : > { %v898_v12 = vsel %vm897_vm3, %v896_v11, %v892_v10 }
 0x12d   : > { %v899_v13 = vadd.f32 %v898_v12, %v860_v9 }
 0x12f   : > { %900 = vst [vmem:[%s1803_s27] sm:$0xf] %v899_v13 }
 0x130 PF: > { %s16_s20 = sadd.s32 1, %s1538_s20   ;;  %s1830_s18 = smov %s1534_s19 }
 0x131   : > { %p13_p5 = scmp.ge.s32.totalorder %s16_s20, 4   ;;  %s1831_s19 = smov %s1833_s21 }
 0x133   :  { %15 = sbr.rel (!%p13_p5) target bundleno = 2 (0x2), region = 99 }

// kernel: conv_module_forward.4
= control target key start
LH: loop header
LB: loop body
LE: loop exit
PB: predicated region body
PF: predicated region fallthrough
CT: control target
= control target key end

     0   :  { %s1110_s30 = smov 0   ;;  %s1112_s10 = smov 0   ;;  %s1275_s0 = inlined_call_operand.vmem [shape: f32[2,16,128], index: 0, kind: input, shape index: {}]   ;;  %s1276_s1 = inlined_call_operand.vmem [shape: f32[2,16,128], index: 1, kind: input, shape index: {}]   ;;  %s1277_s2 = inlined_call_operand.vmem [shape: f32[1,128], index: 2, kind: input, shape index: {}]   ;;  %s1278_s3 = inlined_call_operand.vmem [shape: f32[1,128], index: 3, kind: input, shape index: {}]   ;;  %s1279_s4 = inlined_call_operand.vmem [shape: f32[1,128], index: 4, kind: input, shape index: {}]   ;;  %s1280_s5 = inlined_call_operand.vmem [shape: f32[1,128], index: 5, kind: input, shape index: {}]   ;;  %s1281_s6 = inlined_call_operand.vmem [shape: f32[128,128], index: 6, kind: input, shape index: {}]   ;;  %s1282_s7 = inlined_call_operand.vmem [shape: f32[128,128], index: 7, kind: input, shape index: {}]   ;;  %s1283_s8 = inlined_call_operand.vmem [shape: f32[2,16,128], index: 8, kind: output, shape index: {0}]   ;;  %s1284_s9 = inlined_call_operand.vmem [shape: f32[2,2,128], index: 9, kind: output, shape index: {1}]  }
   0x1   :  { %s1114_s11 = smov 0  }
   0x2 LB: > { %s32_s12 = sadd.s32 1, %s1053_s10  ;;  %p821_p0 = scmp.ge.s32.totalorder %s1057_s11, 1  ;;  %s1057_s11 = sphi %s1114_s11, %s20_s11   ;;  %s1053_s10 = sphi %s1112_s10, %s1286_s10   ;;  %s1049_s30 = sphi %s1110_s30, %s1285_s30  }
   0x3   : > { %p34_p1 = scmp.ge.s32.totalorder %s32_s12, 2  ;;  %p328_p2 = scmp.lt.s32.totalorder %s1057_s11, 3 }
   0x5   : > { %s1288_s12 = smov (%p34_p1, %s32_s12), 0  ;;  %p329_p3 = pnand %p821_p0, %p328_p2 }
   0x6   : > { %v487_v0 = vld [vmem:[%s1282_s7] sm:$0xff] (!%p329_p3)  ;;  %v488_v1 = vld [vmem:[%s1282_s7 + $0x8] sm:$0xff] (!%p329_p3)  ;;  %p386_p4 = scmp.lt.s32.totalorder (!%p329_p3), %s1049_s30, 1  ;;  %v489_v5 = vld [vmem:[%s1282_s7 + $0x10] sm:$0xff] (!%p329_p3)  ;;  %v1059_v20 = vmov (!%p329_p3), 0.0   ;;  %vm677_vm4 = vcmask (!%p329_p3), 1040384  }
   0x7   : > { %332 = sbr.rel (%p329_p3) target bundleno = 277 (0x115), region = 52  ;;  %v471_v2 = vld [vmem:[%s1281_s6] sm:$0xff] (!%p329_p3)  ;;  %v944_v3 = vpack.c.bf16 (!%p329_p3), %v488_v1, %v487_v0  ;;  %v472_v4 = vld [vmem:[%s1281_s6 + $0x8] sm:$0xff] (!%p329_p3)  ;;  %v490_v6 = vld [vmem:[%s1282_s7 + $0x18] sm:$0xff] (!%p329_p3) }
   0x8   : > { %v976_v7 = vpack.c.bf16 (!%p329_p3), %v472_v4, %v471_v2  ;;  %v948_v8 = vpack.c.bf16 (!%p329_p3), %v490_v6, %v489_v5  ;;  %v473_v9 = vld [vmem:[%s1281_s6 + $0x10] sm:$0xff] (!%p329_p3)  ;;  %v474_v10 = vld [vmem:[%s1281_s6 + $0x18] sm:$0xff] (!%p329_p3)  ;;  %v491_v11 = vld [vmem:[%s1282_s7 + $0x20] sm:$0xff] (!%p329_p3) }
   0x9   : > { %945 = vmatprep.subr.bf16.mxu1 (!%p329_p3), %v944_v3  ;;  %v980_v12 = vpack.c.bf16 (!%p329_p3), %v474_v10, %v473_v9  ;;  %v492_v13 = vld [vmem:[%s1282_s7 + $0x28] sm:$0xff] (!%p329_p3)  ;;  %v475_v14 = vld [vmem:[%s1281_s6 + $0x20] sm:$0xff] (!%p329_p3)  ;;  %v493_v18 = vld [vmem:[%s1282_s7 + $0x30] sm:$0xff] (!%p329_p3) }
   0xa   : > { %v476_v15 = vld [vmem:[%s1281_s6 + $0x28] sm:$0xff] (!%p329_p3)  ;;  %977 = vmatprep.subr.bf16.mxu0 (!%p329_p3), %v976_v7  ;;  %947 = vmatpush3.bf16.msra.mxu1 (!%p329_p3), %v944_v3  ;;  %v952_v16 = vpack.c.bf16 (!%p329_p3), %v492_v13, %v491_v11  ;;  %v494_v19 = vld [vmem:[%s1282_s7 + $0x38] sm:$0xff] (!%p329_p3)  ;;  %v477_v21 = vld [vmem:[%s1281_s6 + $0x30] sm:$0xff] (!%p329_p3) }
   0xb   : > { %979 = vmatpush3.bf16.msra.mxu0 (!%p329_p3), %v976_v7  ;;  %949 = vmatprep.subr.bf16.mxu1 (!%p329_p3), %v948_v8  ;;  %v984_v17 = vpack.c.bf16 (!%p329_p3), %v476_v15, %v475_v14  ;;  %v478_v22 = vld [vmem:[%s1281_s6 + $0x38] sm:$0xff] (!%p329_p3)  ;;  %v956_v23 = vpack.c.bf16 (!%p329_p3), %v494_v19, %v493_v18  ;;  %v495_v24 = vld [vmem:[%s1282_s7 + $0x40] sm:$0xff] (!%p329_p3)  ;;  %v496_v25 = vld [vmem:[%s1282_s7 + $0x48] sm:$0xff] (!%p329_p3) }
   0xc   : > { %981 = vmatprep.subr.bf16.mxu0 (!%p329_p3), %v980_v12  ;;  %v988_v26 = vpack.c.bf16 (!%p329_p3), %v478_v22, %v477_v21  ;;  %v479_v27 = vld [vmem:[%s1281_s6 + $0x40] sm:$0xff] (!%p329_p3)  ;;  %v480_v28 = vld [vmem:[%s1281_s6 + $0x48] sm:$0xff] (!%p329_p3)  ;;  %v960_v36 = vpack.c.bf16 (!%p329_p3), %v496_v25, %v495_v24  ;;  %v497_v39 = vld [vmem:[%s1282_s7 + $0x50] sm:$0xff] (!%p329_p3) }
   0xd   : > { %v831_v30 = vld [vmem:[%s1279_s4] ss:$0 sm:$0xff] (!%p329_p3)  ;;  %v992_v38 = vpack.c.bf16 (!%p329_p3), %v480_v28, %v479_v27  ;;  %v498_v40 = vld [vmem:[%s1282_s7 + $0x58] sm:$0xff] (!%p329_p3)  ;;  %v481_v42 = vld [vmem:[%s1281_s6 + $0x50] sm:$0xff] (!%p329_p3) }
   0xe   : > { %s1290_s30 = smov (!%p386_p4, %s1049_s30), 1  ;;  %951 = vmatpush3.bf16.msra.mxu1 %v948_v8  ;;  %v832_v31 = vld [vmem:[%s1280_s5] ss:$0 sm:$0xff]  ;;  %v482_v43 = vld [vmem:[%s1281_s6 + $0x58] sm:$0xff]  ;;  %v964_v46 = vpack.c.bf16 %v498_v40, %v497_v39  ;;  %v500_v51 = vld [vmem:[%s1282_s7 + $0x68] sm:$0xff] }
   0xf   : > { %s1164_s20 = sshll.u32 %s1290_s30, 4  ;;  %s828_s21 = sshll.u32 %s1290_s30, 1  ;;  %983 = vmatpush3.bf16.msra.mxu0 %v980_v12  ;;  %953 = vmatprep.subr.bf16.mxu1 %v952_v16  ;;  %v829_v34 = vld [vmem:[%s1277_s2] ss:$0 sm:$0xff]  ;;  %v996_v49 = vpack.c.bf16 %v482_v43, %v481_v42  ;;  %v484_v55 = vld [vmem:[%s1281_s6 + $0x68] sm:$0xff]  ;;  %v501_v61 = vld [vmem:[%s1282_s7 + $0x70] sm:$0xff] }
  0x10   : > { %s1169_s24 = scalar_lea.vmem %s1284_s9, %s828_s21  ;;  %s1188_s17 = scalar_lea.vmem %s1276_s1, %s1164_s20  ;;  %985 = vmatprep.subr.bf16.mxu0 %v984_v17  ;;  %v830_v35 = vld [vmem:[%s1278_s3] ss:$0 sm:$0xff]  ;;  %v502_v62 = vld [vmem:[%s1282_s7 + $0x78] sm:$0xff]  ;;  %v485_v63 = vld [vmem:[%s1281_s6 + $0x70] sm:$0xff] }
  0x11   : > { %659 = vst [vmem:[%s1169_s24] sm:$0x3] %v1059_v20  ;;  %s1194_s21 = scalar_lea.vmem %s1275_s0, %s1164_s20  ;;  %v445_v29 = vld [vmem:[%s1188_s17] sm:$0xff]  ;;  %v446_v48 = vld [vmem:[%s1188_s17 + $0x8] sm:$0xff]  ;;  %v486_v0 = vld [vmem:[%s1281_s6 + $0x78] sm:$0xff]  ;;  %v972_v2 = vpack.c.bf16 %v502_v62, %v501_v61  ;;  %s413_s18 = scalar_lea.vmem %s1283_s8, %s1164_s20 }
  0x12   : > { %v419_v32 = vld [vmem:[%s1194_s21] sm:$0xff]  ;;  %955 = vmatpush3.bf16.msra.mxu1 %v952_v16  ;;  %v454_v33 = vmul.f32 %v831_v30, %v445_v29  ;;  %v420_v53 = vld [vmem:[%s1194_s21 + $0x8] sm:$0xff]  ;;  %v455_v57 = vmul.f32 %v831_v30, %v446_v48  ;;  %v1004_v4 = vpack.c.bf16 %v486_v0, %v485_v63 }
  0x13   : > { %987 = vmatpush3.bf16.msra.mxu0 %v984_v17  ;;  %957 = vmatprep.subr.bf16.mxu1 %v956_v23  ;;  %v428_v37 = vmul.f32 %v829_v34, %v419_v32  ;;  %v499_v50 = vld [vmem:[%s1282_s7 + $0x60] sm:$0xff]  ;;  %v429_v59 = vmul.f32 %v829_v34, %v420_v53 }
  0x14   : > { %989 = vmatprep.subr.bf16.mxu0 %v988_v26  ;;  %v463_v41 = vadd.f32 %v832_v31, %v454_v33  ;;  %v483_v54 = vld [vmem:[%s1281_s6 + $0x60] sm:$0xff]  ;;  %v968_v58 = vpack.c.bf16 %v500_v51, %v499_v50  ;;  %v464_v1 = vadd.f32 %v832_v31, %v455_v57 }
  0x15   : > { %v437_v44 = vadd.f32 %v830_v35, %v428_v37  ;;  %v1000_v60 = vpack.c.bf16 %v484_v55, %v483_v54  ;;  %v438_v3 = vadd.f32 %v830_v35, %v429_v59 }
  0x16   : > { %959 = vmatpush3.bf16.msra.mxu1 %v956_v23  ;;  %vm465_vm0 = vcmp.ge.f32.partialorder %v463_v41, 0.0  ;;  %v467_v45 = vmul.f32 0.01, %v463_v41  ;;  %v468_v5 = vmul.f32 0.01, %v464_v1  ;;  %vm466_vm2 = vcmp.ge.f32.partialorder %v464_v1, 0.0 }
  0x17   : > { %991 = vmatpush3.bf16.msra.mxu0 %v988_v26  ;;  %961 = vmatprep.subr.bf16.mxu1 %v960_v36  ;;  %vm439_vm1 = vcmp.ge.f32.partialorder %v437_v44, 0.0  ;;  %v441_v47 = vmul.f32 0.01, %v437_v44  ;;  %v442_v6 = vmul.f32 0.01, %v438_v3  ;;  %vm440_vm3 = vcmp.ge.f32.partialorder %v438_v3, 0.0 }
  0x18   : > { %993 = vmatprep.subr.bf16.mxu0 %v992_v38  ;;  %v469_v52 = vsel %vm465_vm0, %v463_v41, %v467_v45  ;;  %v470_v7 = vsel %vm466_vm2, %v464_v1, %v468_v5  ;;  %v660_v29 = vld [vmem:[%s1169_s24] sm:$0x3] }
  0x19   : > { %906 = vmatprep.mubr.f32.mxu1 %v469_v52  ;;  %v443_v56 = vsel %vm439_vm1, %v437_v44, %v441_v47  ;;  %v444_v8 = vsel %vm440_vm3, %v438_v3, %v442_v6 }
  0x1a   : > { %963 = vmatpush3.bf16.msra.mxu1 %v960_v36  ;;  %941 = vmatprep.mubr.f32.mxu0 %v443_v56 }
  0x1b   : > { %995 = vmatpush3.bf16.msra.mxu0 %v992_v38  ;;  %965 = vmatprep.subr.bf16.mxu1 %v964_v46 }
  0x1c   : > { %997 = vmatprep.subr.bf16.mxu0 %v996_v49 }
  0x1e   : > { %967 = vmatpush3.bf16.msra.mxu1 %v964_v46 }
  0x1f   : > { %999 = vmatpush3.bf16.msra.mxu0 %v996_v49  ;;  %969 = vmatprep.subr.bf16.mxu1 %v968_v58 }
  0x20   : > { %1001 = vmatprep.subr.bf16.mxu0 %v1000_v60 }
  0x22   : > { %971 = vmatpush3.bf16.msra.mxu1 %v968_v58 }
  0x23   : > { %1003 = vmatpush3.bf16.msra.mxu0 %v1000_v60  ;;  %973 = vmatprep.subr.bf16.mxu1 %v972_v2 }
  0x24   : > { %1005 = vmatprep.subr.bf16.mxu0 %v1004_v4 }
  0x26   : > { %975 = vmatpush3.bf16.msra.mxu1 %v972_v2 }
  0x27   : > { %1007 = vmatpush3.bf16.msra.mxu0 %v1004_v4 }
  0x29   : > { %907 = vmatmul.mubr.f32.vlgmr.msra.gmra.mrb[0].mxu1 %v470_v7 }
  0x2a   : > { %942 = vmatmul.mubr.f32.vlgmr.msra.gmra.mrb[0].mxu0 %v444_v8 }
  0xfc   : > { %v908_v9 = vpop.f32.mrb[0].mxu1 }
  0xfd   : > { %v943_v10 = vpop.f32.mrb[0].mxu0  ;;  %v569_v11 = vpop.f32.mrb[1].mxu1 }
  0xfe   : > { %v650_v12 = vadd.f32 %v943_v10, %v908_v9  ;;  %v644_v13 = vpop.f32.mrb[1].mxu0 }
  0xff   : > { %v645_v14 = vadd.f32 %v644_v13, %v569_v11 }
 0x100   : > { %654 = vst [vmem:[%s413_s18 + $0x8] sm:$0xff] %v650_v12  ;;  %v669_v15 = vmul.f32 %v650_v12, %v650_v12 }
 0x101   : > { %653 = vst [vmem:[%s413_s18] sm:$0xff] %v645_v14  ;;  %v661_v16 = vadd.f32 %v650_v12, %v645_v14  ;;  %v668_v17 = vmul.f32 %v645_v14, %v645_v14 }
 0x103   : > { %v662_v18 = vrot.slane %v661_v16, 4  ;;  %v670_v19 = vadd.f32 %v669_v15, %v668_v17 }
 0x105   : > { %v663_v20 = vadd.f32 %v662_v18, %v661_v16  ;;  %v671_v21 = vrot.slane %v670_v19, 4 }
 0x107   : > { %v664_v22 = vrot.slane %v663_v20, 2  ;;  %v672_v23 = vadd.f32 %v671_v21, %v670_v19 }
 0x109   : > { %v665_v24 = vadd.f32 %v664_v22, %v663_v20  ;;  %v673_v25 = vrot.slane %v672_v23, 2 }
 0x10b   : > { %v666_v26 = vrot.slane %v665_v24, 1  ;;  %v674_v27 = vadd.f32 %v673_v25, %v672_v23 }
 0x10d   : > { %v675_v28 = vrot.slane %v674_v27, 1  ;;  %v667_v30 = vadd.f32 %v666_v26, %v665_v24 }
 0x10f   : > { %v676_v31 = vadd.f32 %v675_v28, %v674_v27 }
 0x111   : > { %v678_v32 = vsel %vm677_vm4, %v667_v30, %v676_v31 }
 0x112   : > { %v679_v33 = vadd.f32 %v678_v32, %v660_v29 }
 0x114   : > { %680 = vst [vmem:[%s1169_s24] sm:$0x3] %v679_v33 }
 0x115 PF: > { %s20_s11 = sadd.s32 1, %s1057_s11   ;;  %s1285_s30 = smov %s1053_s10 }
 0x116   : > { %p17_p5 = scmp.ge.s32.totalorder %s20_s11, 4   ;;  %s1286_s10 = smov %s1288_s12 }
 0x118   :  { %19 = sbr.rel (!%p17_p5) target bundleno = 2 (0x2), region = 101 }

// kernel: conv_module_forward.5
= control target key start
LH: loop header
LB: loop body
LE: loop exit
PB: predicated region body
PF: predicated region fallthrough
CT: control target
= control target key end

     0   :  { %s408_s12 = smov 0   ;;  %s410_s13 = smov 0   ;;  %s444_s0 = inlined_call_operand.vmem [shape: f32[2,16,128], index: 0, kind: input, shape index: {}]   ;;  %s445_s1 = inlined_call_operand.vmem [shape: f32[1,128], index: 1, kind: input, shape index: {}]   ;;  %s446_s2 = inlined_call_operand.vmem [shape: f32[1,128], index: 2, kind: input, shape index: {}]   ;;  %s447_s3 = inlined_call_operand.vmem [shape: f32[2,16,128], index: 3, kind: output, shape index: {}]  }
   0x1   :  { %s412_s14 = smov 0  }
   0x2 LB: > { %s25_s15 = sadd.s32 1, %s382_s13  ;;  %p329_p0 = scmp.ge.s32.totalorder %s386_s14, 1  ;;  %s386_s14 = sphi %s412_s14, %s13_s14   ;;  %s382_s13 = sphi %s410_s13, %s449_s13   ;;  %s378_s12 = sphi %s408_s12, %s448_s12  }
   0x3   : > { %p27_p1 = scmp.ge.s32.totalorder %s25_s15, 2  ;;  %p158_p2 = scmp.lt.s32.totalorder %s386_s14, 3 }
   0x5   : > { %s451_s15 = smov (%p27_p1, %s25_s15), 0  ;;  %p159_p3 = pnand %p329_p0, %p158_p2 }
   0x6   : > { %p191_p4 = scmp.lt.s32.totalorder (!%p159_p3), %s378_s12, 1  ;;  %v334_v0 = vld [vmem:[%s445_s1] ss:$0 sm:$0xff] (!%p159_p3) }
   0x7   : > { %162 = sbr.rel (%p159_p3) target bundleno = 26 (0x1a), region = 32  ;;  %v335_v3 = vld [vmem:[%s446_s2] ss:$0 sm:$0xff] (!%p159_p3) }
   0xe   : > { %s453_s12 = smov (!%p191_p4, %s378_s12), 1 }
   0xf   : > { %s338_s16 = sshll.u32 %s453_s12, 4 }
  0x10   : > { %s198_s21 = scalar_lea.vmem %s444_s0, %s338_s16  ;;  %s208_s26 = scalar_lea.vmem %s447_s3, %s338_s16 }
  0x11   : > { %v210_v1 = vld [vmem:[%s198_s21] sm:$0xff]  ;;  %v211_v2 = vld [vmem:[%s198_s21 + $0x8] sm:$0xff] }
  0x12   : > { %v219_v4 = vmul.f32 %v334_v0, %v210_v1  ;;  %v220_v5 = vmul.f32 %v334_v0, %v211_v2 }
  0x14   : > { %v228_v6 = vadd.f32 %v335_v3, %v219_v4  ;;  %v229_v7 = vadd.f32 %v335_v3, %v220_v5 }
  0x16   : > { %vm230_vm0 = vcmp.ge.f32.partialorder %v228_v6, 0.0  ;;  %v232_v8 = vmul.f32 0.01, %v228_v6  ;;  %vm231_vm1 = vcmp.ge.f32.partialorder %v229_v7, 0.0  ;;  %v233_v9 = vmul.f32 0.01, %v229_v7 }
  0x18   : > { %v234_v10 = vsel %vm230_vm0, %v228_v6, %v232_v8  ;;  %v235_v11 = vsel %vm231_vm1, %v229_v7, %v233_v9 }
  0x19   : > { %236 = vst [vmem:[%s208_s26] sm:$0xff] %v234_v10  ;;  %237 = vst [vmem:[%s208_s26 + $0x8] sm:$0xff] %v235_v11 }
  0x1a PF: > { %s13_s14 = sadd.s32 1, %s386_s14   ;;  %s448_s12 = smov %s382_s13 }
  0x1b   : > { %p10_p5 = scmp.ge.s32.totalorder %s13_s14, 4   ;;  %s449_s13 = smov %s451_s15 }
  0x1d   :  { %12 = sbr.rel (!%p10_p5) target bundleno = 2 (0x2), region = 62 }

</bundles_post_ra>
